<compile_context>
chip_gen: v5e
topology: v5e:2x2
jax: 0.10.0
libtpu: 0.0.40
codegen_flags: <defaults>
</compile_context>

<pallas_src>
import functools
import math

import jax
import jax.numpy as jnp
from jax.experimental import pallas as pl
from jax.experimental.pallas import tpu as pltpu


def _layernorm(x32, w, b, eps=1e-5):
    # LayerNorm subclass in the reference always computes in float32.
    mu = jnp.mean(x32, axis=-1, keepdims=True)
    var = jnp.mean(jnp.square(x32 - mu), axis=-1, keepdims=True)
    return (x32 - mu) * jax.lax.rsqrt(var + eps) * w + b


def _transformer_kernel(
    x_hbm_ref,                # (N*L, D) f32 in HBM (aliased with the output)
    ln1_w_ref, ln1_b_ref,     # (1, D) f32
    wqkv_ref, bqkv_ref,       # (D, 3D) bf16 (Q cols pre-scaled), (1, 3D) f32
    wo_ref, bo_ref,           # (D, D)  bf16, (1, D)  f32
    ln2_w_ref, ln2_b_ref,     # (1, D) f32
    wfc_ref, bfc_ref,         # (D, 4D) bf16, (1, 4D) f32
    wproj_ref, bproj_ref,     # (4D, D) bf16, (1, D)  f32
    out_ref,                  # (bt*L, D) f32 residual carrier (resident over layers)
    *, n_head, bt, seq,
):
    layer = pl.program_id(1)
    btile = pl.program_id(0)
    rows, d_model = out_ref.shape
    d_head = d_model // n_head

    # Initialize this batch tile's residual stream straight from HBM once.
    @pl.when(layer == 0)
    def _():
        start = btile * rows
        if rows % 8 == 0:
            start = pl.multiple_of(start, 8)
        pltpu.sync_copy(x_hbm_ref.at[pl.ds(start, rows), :], out_ref)

    xb = out_ref[...]                                             # (rows, D) f32

    # ---------------- attention branch ----------------
    xln = _layernorm(xb, ln1_w_ref[...], ln1_b_ref[...]).astype(jnp.bfloat16)
    qkv = jnp.dot(xln, wqkv_ref[...],
                  preferred_element_type=jnp.float32) + bqkv_ref[...]  # (rows, 3D)
    # 1/sqrt(d_head) is already folded into the Q columns / Q bias on the host.

    o_parts = []
    for n in range(bt):                      # small static loop over sequences
        blk = qkv[n * seq:(n + 1) * seq, :]                       # (L, 3D)
        q = blk[:, :d_model].astype(jnp.bfloat16).reshape(seq, n_head, d_head)
        k = blk[:, d_model:2 * d_model].astype(jnp.bfloat16).reshape(seq, n_head, d_head)
        v = blk[:, 2 * d_model:].astype(jnp.bfloat16).reshape(seq, n_head, d_head)
        qh = pltpu.einshape("lhd->hld", q)                        # (H, L, dh)
        kh = pltpu.einshape("lhd->hld", k)
        vh = pltpu.einshape("lhd->hld", v)

        s = jnp.einsum("hqd,hkd->hqk", qh, kh,
                       preferred_element_type=jnp.float32)        # (H, L, L)
        s = s - jnp.max(s, axis=-1, keepdims=True)
        p = jnp.exp(s)
        p = p * pl.reciprocal(jnp.sum(p, axis=-1, keepdims=True), approx=True)

        oh = jnp.einsum("hqk,hkd->hqd", p.astype(jnp.bfloat16), vh,
                        preferred_element_type=jnp.float32)       # (H, L, dh)
        ol = pltpu.einshape("hld->lhd", oh.astype(jnp.bfloat16))  # (L, H, dh)
        o_parts.append(ol.reshape(seq, d_model))                  # (L, D) bf16
    o_all = o_parts[0] if bt == 1 else jnp.concatenate(o_parts, axis=0)  # (rows, D)

    # Single full-K out-projection matmul for all heads / all sequences.
    attn = jnp.dot(o_all, wo_ref[...],
                   preferred_element_type=jnp.float32) + bo_ref[...]
    x1 = xb + attn

    # ---------------- MLP branch ----------------
    xln2 = _layernorm(x1, ln2_w_ref[...], ln2_b_ref[...]).astype(jnp.bfloat16)
    hdn = jnp.dot(xln2, wfc_ref[...],
                  preferred_element_type=jnp.float32) + bfc_ref[...]   # (rows, 4D) f32
    h_bf = hdn.astype(jnp.bfloat16)
    act = h_bf * jax.nn.sigmoid(1.702 * h_bf)           # QuickGELU in bf16
    mlp = jnp.dot(act, wproj_ref[...],
                  preferred_element_type=jnp.float32) + bproj_ref[...]  # (rows, D)

    out_ref[...] = (x1 + mlp).astype(out_ref.dtype)


def _pick_vmem_limit():
    """Generation-aware VMEM cap: ~85% of per-core VMEM, clamped to 110 MiB."""
    try:
        cap = int(pltpu.get_tpu_info().vmem_capacity_bytes)
    except Exception:
        cap = 64 * 1024 * 1024          # conservative fallback (fits v7x too)
    return max(32 * 1024 * 1024, min(int(cap * 0.85), 110 * 1024 * 1024))


def transformer_forward(x_lnd, params, *, heads, batch_tiles=None):
    """x_lnd: (L, N, D), seq-first like the PyTorch module."""
    L, N, D = x_lnd.shape
    layers = params["wqkv"].shape[0]
    assert D % heads == 0
    d_head = D // heads

    # Megacore gating: only split the batch across TensorCores when large
    # enough to be compute-bound (splitting re-streams weights per tile).
    if batch_tiles is None:
        batch_tiles = 2 if (N % 2 == 0 and N * L >= 2048) else 1
    assert N % batch_tiles == 0
    bt = N // batch_tiles
    NL = N * L

    # Residual carrier is forced to f32 regardless of caller dtype.
    x_2d = jnp.transpose(x_lnd, (1, 0, 2)).reshape(NL, D).astype(jnp.float32)

    # Host-side weight prep: transpose to x@W layout, fold 1/sqrt(dh) into the
    # Q columns / Q bias, cast weights to bf16 (biases stay f32).
    scale = 1.0 / math.sqrt(d_head)
    wqkv_t = jnp.swapaxes(params["wqkv"], 1, 2)                       # (layers, D, 3D)
    wqkv_t = wqkv_t.at[:, :, :D].multiply(scale).astype(jnp.bfloat16)
    bqkv = params["bqkv"].at[:, :, :D].multiply(scale)                # (layers, 1, 3D)
    wo_t = jnp.swapaxes(params["wo"], 1, 2).astype(jnp.bfloat16)      # (layers, D, D)
    wfc_t = jnp.swapaxes(params["wfc"], 1, 2).astype(jnp.bfloat16)    # (layers, D, 4D)
    wproj_t = jnp.swapaxes(params["wproj"], 1, 2).astype(jnp.bfloat16)  # (layers, 4D, D)

    def w_spec(r, c):
        # per-layer weight block; layer dim squeezed out of the kernel Ref.
        # TODO(synk): if profiling shows exposed weight DMA on v5e/v6e, add
        # pipeline_mode=pl.Buffered(3) to the big weight specs.
        return pl.BlockSpec((pl.Squeezed(), r, c), lambda b, l: (l, 0, 0))

    kernel = functools.partial(_transformer_kernel, n_head=heads, bt=bt, seq=L)

    # Advisory cost estimate so XLA schedules surrounding ops around the call.
    flops = int(layers * (24 * NL * D * D + 4 * N * L * L * D))
    transc = int(layers * (N * heads * L * L + NL * 4 * D + 2 * NL))
    bytes_accessed = int(layers * batch_tiles * 24 * D * D + 3 * NL * D * 4)

    out_2d = pl.pallas_call(
        kernel,
        out_shape=jax.ShapeDtypeStruct((NL, D), jnp.float32),
        grid_spec=pltpu.PrefetchScalarGridSpec(
            num_scalar_prefetch=0,
            grid=(batch_tiles, layers),
            in_specs=[
                pl.BlockSpec(memory_space=pl.ANY),      # x stays in HBM
                w_spec(1, D), w_spec(1, D),             # ln_1 w, b
                w_spec(D, 3 * D), w_spec(1, 3 * D),     # in_proj  W^T, b
                w_spec(D, D), w_spec(1, D),             # out_proj W^T, b
                w_spec(1, D), w_spec(1, D),             # ln_2 w, b
                w_spec(D, 4 * D), w_spec(1, 4 * D),     # mlp.c_fc W^T, b
                w_spec(4 * D, D), w_spec(1, D),         # mlp.c_proj W^T, b
            ],
            out_specs=pl.BlockSpec((bt * L, D), lambda b, l: (b, 0)),
        ),
        input_output_aliases={0: 0},                    # x buffer -> residual carrier
        compiler_params=pltpu.CompilerParams(
            dimension_semantics=("parallel", "arbitrary"),
            vmem_limit_bytes=_pick_vmem_limit(),
        ),
        cost_estimate=pl.CostEstimate(
            flops=flops, transcendentals=transc, bytes_accessed=bytes_accessed),
    )(x_2d,
      params["ln1_w"], params["ln1_b"],
      wqkv_t, bqkv,
      wo_t, params["bo"],
      params["ln2_w"], params["ln2_b"],
      wfc_t, params["bfc"],
      wproj_t, params["bproj"])

    return jnp.transpose(out_2d.reshape(N, L, D), (1, 0, 2)).astype(x_lnd.dtype)


def transformer_ref(x_lnd, params, *, heads):
    """Pure-JAX f32 reference mirroring the PyTorch forward (for verification)."""
    L, N, D = x_lnd.shape
    layers = params["wqkv"].shape[0]
    dh = D // heads
    x = x_lnd.astype(jnp.float32)

    def ln(v, w, b):
        mu = v.mean(-1, keepdims=True)
        var = ((v - mu) ** 2).mean(-1, keepdims=True)
        return (v - mu) / jnp.sqrt(var + 1e-5) * w + b

    for l in range(layers):
        xln = ln(x, params["ln1_w"][l, 0], params["ln1_b"][l, 0])
        qkv = jnp.einsum("lnd,ed->lne", xln, params["wqkv"][l]) + params["bqkv"][l, 0]
        q, k, v = jnp.split(qkv, 3, axis=-1)
        q = q.reshape(L, N, heads, dh) / math.sqrt(dh)
        k = k.reshape(L, N, heads, dh)
        v = v.reshape(L, N, heads, dh)
        s = jnp.einsum("inhd,jnhd->nhij", q, k)
        p = jax.nn.softmax(s, axis=-1)
        o = jnp.einsum("nhij,jnhd->inhd", p, v).reshape(L, N, D)
        attn = jnp.einsum("lnd,ed->lne", o, params["wo"][l]) + params["bo"][l, 0]
        x = x + attn
        x2 = ln(x, params["ln2_w"][l, 0], params["ln2_b"][l, 0])
        h = jnp.einsum("lnd,ed->lne", x2, params["wfc"][l]) + params["bfc"][l, 0]
        h = h * jax.nn.sigmoid(1.702 * h)
        mlp = jnp.einsum("lnd,ed->lne", h, params["wproj"][l]) + params["bproj"][l, 0]
        x = x + mlp
    return x


def init_params(key, width, layers):
    """Deterministic synthetic parameters (shapes match the PyTorch module)."""
    d = width
    ks = jax.random.split(key, 8)

    def rnd(k, shape, scale=0.05):
        return (scale * jax.random.normal(k, shape)).astype(jnp.float32)

    return {
        "ln1_w": jnp.ones((layers, 1, d), jnp.float32),
        "ln1_b": jnp.zeros((layers, 1, d), jnp.float32),
        "wqkv": rnd(ks[0], (layers, 3 * d, d)),       # attn.in_proj_weight
        "bqkv": rnd(ks[1], (layers, 1, 3 * d)),       # attn.in_proj_bias
        "wo": rnd(ks[2], (layers, d, d)),             # attn.out_proj.weight
        "bo": rnd(ks[3], (layers, 1, d)),             # attn.out_proj.bias
        "ln2_w": jnp.ones((layers, 1, d), jnp.float32),
        "ln2_b": jnp.zeros((layers, 1, d), jnp.float32),
        "wfc": rnd(ks[4], (layers, 4 * d, d)),        # mlp.c_fc.weight
        "bfc": rnd(ks[5], (layers, 1, 4 * d)),        # mlp.c_fc.bias
        "wproj": rnd(ks[6], (layers, d, 4 * d)),      # mlp.c_proj.weight
        "bproj": rnd(ks[7], (layers, 1, d)),          # mlp.c_proj.bias
    }


if __name__ == "__main__":
    # Transformer(width=32, layers=2, heads=4), attn_mask=None
    WIDTH, LAYERS, HEADS = 32, 2, 4
    SEQ, BATCH = 8, 2

    key = jax.random.PRNGKey(0)
    kx, kp = jax.random.split(key)
    x = jax.random.normal(kx, (SEQ, BATCH, WIDTH), dtype=jnp.float32)  # (L, N, D)
    params = init_params(kp, WIDTH, LAYERS)

    ref = transformer_ref(x, params, heads=HEADS)

    # Exercise both the single-tile path and the 2-tile (megacore) path.
    for n_tiles in (1, 2):
        out = transformer_forward(x, params, heads=HEADS, batch_tiles=n_tiles)
        out = jax.block_until_ready(out)
        assert out.shape == (SEQ, BATCH, WIDTH)
        # bf16 matmuls (f32 accumulation) + approx reciprocal vs f32 reference.
        max_err = float(jnp.max(jnp.abs(out - ref)))
        assert jnp.allclose(out, ref, rtol=2e-2, atol=2e-2), (n_tiles, max_err)

    print("KERNEL_OK")
</pallas_src>

<mosaic_0001>
module attributes {stable_mosaic.version = 11 : i64} {
  func.func @_transformer_kernel(%arg0: i32, %arg1: i32, %arg2: memref<16x32xf32, #tpu.memory_space<any>>, %arg3: memref<1x1x32xf32, #tpu.memory_space<vmem>>, %arg4: memref<1x1x32xf32, #tpu.memory_space<vmem>>, %arg5: memref<1x32x96xbf16, #tpu.memory_space<vmem>>, %arg6: memref<1x1x96xf32, #tpu.memory_space<vmem>>, %arg7: memref<1x32x32xbf16, #tpu.memory_space<vmem>>, %arg8: memref<1x1x32xf32, #tpu.memory_space<vmem>>, %arg9: memref<1x1x32xf32, #tpu.memory_space<vmem>>, %arg10: memref<1x1x32xf32, #tpu.memory_space<vmem>>, %arg11: memref<1x32x128xbf16, #tpu.memory_space<vmem>>, %arg12: memref<1x1x128xf32, #tpu.memory_space<vmem>>, %arg13: memref<1x128x32xbf16, #tpu.memory_space<vmem>>, %arg14: memref<1x1x32xf32, #tpu.memory_space<vmem>>, %arg15: memref<16x32xf32, #tpu.memory_space<vmem>>) attributes {dimension_semantics = [#tpu.dimension_semantics<parallel>, #tpu.dimension_semantics<arbitrary>], iteration_bounds = array<i64: 1, 2>, scalar_prefetch = 0 : i64, scratch_operands = 0 : i64, tpu.core_type = #tpu.core_type<tc>, window_params = [{}, {transform_indices = @transform_1, window_bounds = array<i64: 1, 1, 32>}, {transform_indices = @transform_2, window_bounds = array<i64: 1, 1, 32>}, {transform_indices = @transform_3, window_bounds = array<i64: 1, 32, 96>}, {transform_indices = @transform_4, window_bounds = array<i64: 1, 1, 96>}, {transform_indices = @transform_5, window_bounds = array<i64: 1, 32, 32>}, {transform_indices = @transform_6, window_bounds = array<i64: 1, 1, 32>}, {transform_indices = @transform_7, window_bounds = array<i64: 1, 1, 32>}, {transform_indices = @transform_8, window_bounds = array<i64: 1, 1, 32>}, {transform_indices = @transform_9, window_bounds = array<i64: 1, 32, 128>}, {transform_indices = @transform_10, window_bounds = array<i64: 1, 1, 128>}, {transform_indices = @transform_11, window_bounds = array<i64: 1, 128, 32>}, {transform_indices = @transform_12, window_bounds = array<i64: 1, 1, 32>}, {transform_indices = @transform_13, window_bounds = array<i64: 16, 32>}]} {
    %c0_i32 = arith.constant 0 : i32
    %0 = arith.cmpi eq, %arg1, %c0_i32 : i32
    %1 = arith.extui %0 : i1 to i32
    %c0_i32_0 = arith.constant 0 : i32
    %2 = arith.cmpi ne, %1, %c0_i32_0 : i32
    scf.if %2 {
      %c16_i32 = arith.constant 16 : i32
      %157 = arith.muli %arg0, %c16_i32 : i32
      %158 = tpu.assume_multiple %157, 8 : i32
      "tpu.region"() ({
        %159 = tpu.sem_alloc : memref<!tpu.dma_semaphore, #tpu.memory_space<semaphore_mem>>
        %c0_i32_63 = arith.constant 0 : i32
        %160 = tpu.memref_slice %arg2[%158, %c0_i32_63] : memref<16x32xf32, #tpu.memory_space<any>> -> memref<16x32xf32, #tpu.memory_space<any>>
        tpu.enqueue_dma source(%160 : memref<16x32xf32, #tpu.memory_space<any>>) target(%arg15 : memref<16x32xf32, #tpu.memory_space<vmem>>) target_semaphore(%159 : memref<!tpu.dma_semaphore, #tpu.memory_space<semaphore_mem>>)
        %c0_i32_64 = arith.constant 0 : i32
        %161 = tpu.memref_slice %arg2[%158, %c0_i32_64] : memref<16x32xf32, #tpu.memory_space<any>> -> memref<16x32xf32, #tpu.memory_space<any>>
        tpu.wait_dma2 semaphore(%159 : memref<!tpu.dma_semaphore, #tpu.memory_space<semaphore_mem>>) src(%161 : memref<16x32xf32, #tpu.memory_space<any>>) dst(%arg15 : memref<16x32xf32, #tpu.memory_space<vmem>>)
        tpu.yield
      }) : () -> ()
    } else {
    }
    %c0 = arith.constant 0 : index
    %c0_1 = arith.constant 0 : index
    %3 = vector.load %arg15[%c0, %c0_1] : memref<16x32xf32, #tpu.memory_space<vmem>>, vector<16x32xf32>
    %c0_2 = arith.constant 0 : index
    %c0_3 = arith.constant 0 : index
    %c0_4 = arith.constant 0 : index
    %4 = vector.load %arg3[%c0_2, %c0_3, %c0_4] : memref<1x1x32xf32, #tpu.memory_space<vmem>>, vector<1x1x32xf32>
    %5 = vector.shape_cast %4 : vector<1x1x32xf32> to vector<1x32xf32>
    %c0_5 = arith.constant 0 : index
    %c0_6 = arith.constant 0 : index
    %c0_7 = arith.constant 0 : index
    %6 = vector.load %arg4[%c0_5, %c0_6, %c0_7] : memref<1x1x32xf32, #tpu.memory_space<vmem>>, vector<1x1x32xf32>
    %7 = vector.shape_cast %6 : vector<1x1x32xf32> to vector<1x32xf32>
    %cst = arith.constant dense<0.000000e+00> : vector<16xf32>
    %8 = vector.multi_reduction <add>, %3, %cst [1] : vector<16x32xf32> to vector<16xf32>
    %9 = vector.shape_cast %8 : vector<16xf32> to vector<16x1xf32>
    %cst_8 = arith.constant 3.200000e+01 : f32
    %10 = vector.broadcast %cst_8 : f32 to vector<16x1xf32>
    %11 = arith.divf %9, %10 : vector<16x1xf32>
    %12 = vector.broadcast %11 : vector<16x1xf32> to vector<16x32xf32>
    %13 = arith.subf %3, %12 : vector<16x32xf32>
    %14 = arith.mulf %13, %13 : vector<16x32xf32>
    %cst_9 = arith.constant dense<0.000000e+00> : vector<16xf32>
    %15 = vector.multi_reduction <add>, %14, %cst_9 [1] : vector<16x32xf32> to vector<16xf32>
    %16 = vector.shape_cast %15 : vector<16xf32> to vector<16x1xf32>
    %cst_10 = arith.constant 3.200000e+01 : f32
    %17 = vector.broadcast %cst_10 : f32 to vector<16x1xf32>
    %18 = arith.divf %16, %17 : vector<16x1xf32>
    %19 = vector.broadcast %11 : vector<16x1xf32> to vector<16x32xf32>
    %20 = arith.subf %3, %19 : vector<16x32xf32>
    %cst_11 = arith.constant 9.99999974E-6 : f32
    %21 = vector.broadcast %cst_11 : f32 to vector<16x1xf32>
    %22 = arith.addf %18, %21 : vector<16x1xf32>
    %23 = math.rsqrt %22 : vector<16x1xf32>
    %24 = vector.broadcast %23 : vector<16x1xf32> to vector<16x32xf32>
    %25 = arith.mulf %20, %24 : vector<16x32xf32>
    %26 = vector.broadcast %5 : vector<1x32xf32> to vector<16x32xf32>
    %27 = arith.mulf %25, %26 : vector<16x32xf32>
    %28 = vector.broadcast %7 : vector<1x32xf32> to vector<16x32xf32>
    %29 = arith.addf %27, %28 : vector<16x32xf32>
    %30 = arith.truncf %29 : vector<16x32xf32> to vector<16x32xbf16>
    %c0_12 = arith.constant 0 : index
    %c0_13 = arith.constant 0 : index
    %c0_14 = arith.constant 0 : index
    %31 = vector.load %arg5[%c0_12, %c0_13, %c0_14] : memref<1x32x96xbf16, #tpu.memory_space<vmem>>, vector<1x32x96xbf16>
    %32 = vector.shape_cast %31 : vector<1x32x96xbf16> to vector<32x96xbf16>
    %cst_15 = arith.constant dense<0.000000e+00> : vector<16x96xf32>
    %33 = tpu.matmul %30, %32, %cst_15 {dimension_numbers = #tpu.dot_dimension_numbers<[1], [0], [0], [1], [0, 0, 1, 1], [], []>} : vector<16x32xbf16>, vector<32x96xbf16>, vector<16x96xf32> -> vector<16x96xf32>
    %c0_16 = arith.constant 0 : index
    %c0_17 = arith.constant 0 : index
    %c0_18 = arith.constant 0 : index
    %34 = vector.load %arg6[%c0_16, %c0_17, %c0_18] : memref<1x1x96xf32, #tpu.memory_space<vmem>>, vector<1x1x96xf32>
    %35 = vector.shape_cast %34 : vector<1x1x96xf32> to vector<1x96xf32>
    %36 = vector.broadcast %35 : vector<1x96xf32> to vector<16x96xf32>
    %37 = arith.addf %33, %36 : vector<16x96xf32>
    %38 = vector.extract_strided_slice %37 {offsets = [0, 0], sizes = [8, 96], strides = [1, 1]} : vector<16x96xf32> to vector<8x96xf32>
    %39 = vector.extract_strided_slice %38 {offsets = [0, 0], sizes = [8, 32], strides = [1, 1]} : vector<8x96xf32> to vector<8x32xf32>
    %40 = arith.truncf %39 : vector<8x32xf32> to vector<8x32xbf16>
    %41 = vector.shape_cast %40 : vector<8x32xbf16> to vector<8x4x8xbf16>
    %42 = vector.extract_strided_slice %38 {offsets = [0, 32], sizes = [8, 32], strides = [1, 1]} : vector<8x96xf32> to vector<8x32xf32>
    %43 = arith.truncf %42 : vector<8x32xf32> to vector<8x32xbf16>
    %44 = vector.shape_cast %43 : vector<8x32xbf16> to vector<8x4x8xbf16>
    %45 = vector.extract_strided_slice %38 {offsets = [0, 64], sizes = [8, 32], strides = [1, 1]} : vector<8x96xf32> to vector<8x32xf32>
    %46 = arith.truncf %45 : vector<8x32xf32> to vector<8x32xbf16>
    %47 = vector.shape_cast %46 : vector<8x32xbf16> to vector<8x4x8xbf16>
    %48 = tpu.transpose %41, [1, 0, 2] : vector<8x4x8xbf16> -> vector<4x8x8xbf16>
    %49 = tpu.transpose %44, [1, 0, 2] : vector<8x4x8xbf16> -> vector<4x8x8xbf16>
    %50 = tpu.transpose %47, [1, 0, 2] : vector<8x4x8xbf16> -> vector<4x8x8xbf16>
    "tpu.trace_start"() <{level = 10 : i32, message = "hqd,hkd->hqk"}> : () -> ()
    %cst_19 = arith.constant dense<0.000000e+00> : vector<4x8x8xf32>
    %51 = tpu.matmul %48, %49, %cst_19 {dimension_numbers = #tpu.dot_dimension_numbers<[2], [2], [1], [1], [0, 0, 0, 1, 1, 1], [0], [0]>} : vector<4x8x8xbf16>, vector<4x8x8xbf16>, vector<4x8x8xf32> -> vector<4x8x8xf32>
    "tpu.trace_stop"() : () -> ()
    %cst_20 = arith.constant dense<0xFF800000> : vector<4x8xf32>
    %52 = vector.multi_reduction <maximumf>, %51, %cst_20 [2] : vector<4x8x8xf32> to vector<4x8xf32>
    %53 = vector.shape_cast %52 : vector<4x8xf32> to vector<4x8x1xf32>
    %54 = vector.broadcast %53 : vector<4x8x1xf32> to vector<4x8x8xf32>
    %55 = arith.subf %51, %54 : vector<4x8x8xf32>
    %56 = math.exp %55 : vector<4x8x8xf32>
    %cst_21 = arith.constant dense<0.000000e+00> : vector<4x8xf32>
    %57 = vector.multi_reduction <add>, %56, %cst_21 [2] : vector<4x8x8xf32> to vector<4x8xf32>
    %58 = vector.shape_cast %57 : vector<4x8xf32> to vector<4x8x1xf32>
    %59 = tpu.reciprocal %58 {approx = true} : vector<4x8x1xf32> -> vector<4x8x1xf32>
    %60 = vector.broadcast %59 : vector<4x8x1xf32> to vector<4x8x8xf32>
    %61 = arith.mulf %56, %60 : vector<4x8x8xf32>
    %62 = arith.truncf %61 : vector<4x8x8xf32> to vector<4x8x8xbf16>
    "tpu.trace_start"() <{level = 10 : i32, message = "hqk,hkd->hqd"}> : () -> ()
    %cst_22 = arith.constant dense<0.000000e+00> : vector<4x8x8xf32>
    %63 = tpu.matmul %62, %50, %cst_22 {dimension_numbers = #tpu.dot_dimension_numbers<[2], [1], [1], [2], [0, 0, 0, 1, 1, 2], [0], [0]>} : vector<4x8x8xbf16>, vector<4x8x8xbf16>, vector<4x8x8xf32> -> vector<4x8x8xf32>
    "tpu.trace_stop"() : () -> ()
    %64 = arith.truncf %63 : vector<4x8x8xf32> to vector<4x8x8xbf16>
    %65 = tpu.transpose %64, [1, 0, 2] : vector<4x8x8xbf16> -> vector<8x4x8xbf16>
    %66 = vector.shape_cast %65 : vector<8x4x8xbf16> to vector<8x32xbf16>
    %67 = vector.extract_strided_slice %37 {offsets = [8, 0], sizes = [8, 96], strides = [1, 1]} : vector<16x96xf32> to vector<8x96xf32>
    %68 = vector.extract_strided_slice %67 {offsets = [0, 0], sizes = [8, 32], strides = [1, 1]} : vector<8x96xf32> to vector<8x32xf32>
    %69 = arith.truncf %68 : vector<8x32xf32> to vector<8x32xbf16>
    %70 = vector.shape_cast %69 : vector<8x32xbf16> to vector<8x4x8xbf16>
    %71 = vector.extract_strided_slice %67 {offsets = [0, 32], sizes = [8, 32], strides = [1, 1]} : vector<8x96xf32> to vector<8x32xf32>
    %72 = arith.truncf %71 : vector<8x32xf32> to vector<8x32xbf16>
    %73 = vector.shape_cast %72 : vector<8x32xbf16> to vector<8x4x8xbf16>
    %74 = vector.extract_strided_slice %67 {offsets = [0, 64], sizes = [8, 32], strides = [1, 1]} : vector<8x96xf32> to vector<8x32xf32>
    %75 = arith.truncf %74 : vector<8x32xf32> to vector<8x32xbf16>
    %76 = vector.shape_cast %75 : vector<8x32xbf16> to vector<8x4x8xbf16>
    %77 = tpu.transpose %70, [1, 0, 2] : vector<8x4x8xbf16> -> vector<4x8x8xbf16>
    %78 = tpu.transpose %73, [1, 0, 2] : vector<8x4x8xbf16> -> vector<4x8x8xbf16>
    %79 = tpu.transpose %76, [1, 0, 2] : vector<8x4x8xbf16> -> vector<4x8x8xbf16>
    "tpu.trace_start"() <{level = 10 : i32, message = "hqd,hkd->hqk"}> : () -> ()
    %cst_23 = arith.constant dense<0.000000e+00> : vector<4x8x8xf32>
    %80 = tpu.matmul %77, %78, %cst_23 {dimension_numbers = #tpu.dot_dimension_numbers<[2], [2], [1], [1], [0, 0, 0, 1, 1, 1], [0], [0]>} : vector<4x8x8xbf16>, vector<4x8x8xbf16>, vector<4x8x8xf32> -> vector<4x8x8xf32>
    "tpu.trace_stop"() : () -> ()
    %cst_24 = arith.constant dense<0xFF800000> : vector<4x8xf32>
    %81 = vector.multi_reduction <maximumf>, %80, %cst_24 [2] : vector<4x8x8xf32> to vector<4x8xf32>
    %82 = vector.shape_cast %81 : vector<4x8xf32> to vector<4x8x1xf32>
    %83 = vector.broadcast %82 : vector<4x8x1xf32> to vector<4x8x8xf32>
    %84 = arith.subf %80, %83 : vector<4x8x8xf32>
    %85 = math.exp %84 : vector<4x8x8xf32>
    %cst_25 = arith.constant dense<0.000000e+00> : vector<4x8xf32>
    %86 = vector.multi_reduction <add>, %85, %cst_25 [2] : vector<4x8x8xf32> to vector<4x8xf32>
    %87 = vector.shape_cast %86 : vector<4x8xf32> to vector<4x8x1xf32>
    %88 = tpu.reciprocal %87 {approx = true} : vector<4x8x1xf32> -> vector<4x8x1xf32>
    %89 = vector.broadcast %88 : vector<4x8x1xf32> to vector<4x8x8xf32>
    %90 = arith.mulf %85, %89 : vector<4x8x8xf32>
    %91 = arith.truncf %90 : vector<4x8x8xf32> to vector<4x8x8xbf16>
    "tpu.trace_start"() <{level = 10 : i32, message = "hqk,hkd->hqd"}> : () -> ()
    %cst_26 = arith.constant dense<0.000000e+00> : vector<4x8x8xf32>
    %92 = tpu.matmul %91, %79, %cst_26 {dimension_numbers = #tpu.dot_dimension_numbers<[2], [1], [1], [2], [0, 0, 0, 1, 1, 2], [0], [0]>} : vector<4x8x8xbf16>, vector<4x8x8xbf16>, vector<4x8x8xf32> -> vector<4x8x8xf32>
    "tpu.trace_stop"() : () -> ()
    %93 = arith.truncf %92 : vector<4x8x8xf32> to vector<4x8x8xbf16>
    %94 = tpu.transpose %93, [1, 0, 2] : vector<4x8x8xbf16> -> vector<8x4x8xbf16>
    %95 = vector.shape_cast %94 : vector<8x4x8xbf16> to vector<8x32xbf16>
    %96 = tpu.concatenate %66, %95 in 0 : vector<8x32xbf16>, vector<8x32xbf16> -> vector<16x32xbf16>
    %c0_27 = arith.constant 0 : index
    %c0_28 = arith.constant 0 : index
    %c0_29 = arith.constant 0 : index
    %97 = vector.load %arg7[%c0_27, %c0_28, %c0_29] : memref<1x32x32xbf16, #tpu.memory_space<vmem>>, vector<1x32x32xbf16>
    %98 = vector.shape_cast %97 : vector<1x32x32xbf16> to vector<32x32xbf16>
    %cst_30 = arith.constant dense<0.000000e+00> : vector<16x32xf32>
    %99 = tpu.matmul %96, %98, %cst_30 {dimension_numbers = #tpu.dot_dimension_numbers<[1], [0], [0], [1], [0, 0, 1, 1], [], []>} : vector<16x32xbf16>, vector<32x32xbf16>, vector<16x32xf32> -> vector<16x32xf32>
    %c0_31 = arith.constant 0 : index
    %c0_32 = arith.constant 0 : index
    %c0_33 = arith.constant 0 : index
    %100 = vector.load %arg8[%c0_31, %c0_32, %c0_33] : memref<1x1x32xf32, #tpu.memory_space<vmem>>, vector<1x1x32xf32>
    %101 = vector.shape_cast %100 : vector<1x1x32xf32> to vector<1x32xf32>
    %102 = vector.broadcast %101 : vector<1x32xf32> to vector<16x32xf32>
    %103 = arith.addf %99, %102 : vector<16x32xf32>
    %104 = arith.addf %3, %103 : vector<16x32xf32>
    %c0_34 = arith.constant 0 : index
    %c0_35 = arith.constant 0 : index
    %c0_36 = arith.constant 0 : index
    %105 = vector.load %arg9[%c0_34, %c0_35, %c0_36] : memref<1x1x32xf32, #tpu.memory_space<vmem>>, vector<1x1x32xf32>
    %106 = vector.shape_cast %105 : vector<1x1x32xf32> to vector<1x32xf32>
    %c0_37 = arith.constant 0 : index
    %c0_38 = arith.constant 0 : index
    %c0_39 = arith.constant 0 : index
    %107 = vector.load %arg10[%c0_37, %c0_38, %c0_39] : memref<1x1x32xf32, #tpu.memory_space<vmem>>, vector<1x1x32xf32>
    %108 = vector.shape_cast %107 : vector<1x1x32xf32> to vector<1x32xf32>
    %cst_40 = arith.constant dense<0.000000e+00> : vector<16xf32>
    %109 = vector.multi_reduction <add>, %104, %cst_40 [1] : vector<16x32xf32> to vector<16xf32>
    %110 = vector.shape_cast %109 : vector<16xf32> to vector<16x1xf32>
    %cst_41 = arith.constant 3.200000e+01 : f32
    %111 = vector.broadcast %cst_41 : f32 to vector<16x1xf32>
    %112 = arith.divf %110, %111 : vector<16x1xf32>
    %113 = vector.broadcast %112 : vector<16x1xf32> to vector<16x32xf32>
    %114 = arith.subf %104, %113 : vector<16x32xf32>
    %115 = arith.mulf %114, %114 : vector<16x32xf32>
    %cst_42 = arith.constant dense<0.000000e+00> : vector<16xf32>
    %116 = vector.multi_reduction <add>, %115, %cst_42 [1] : vector<16x32xf32> to vector<16xf32>
    %117 = vector.shape_cast %116 : vector<16xf32> to vector<16x1xf32>
    %cst_43 = arith.constant 3.200000e+01 : f32
    %118 = vector.broadcast %cst_43 : f32 to vector<16x1xf32>
    %119 = arith.divf %117, %118 : vector<16x1xf32>
    %120 = vector.broadcast %112 : vector<16x1xf32> to vector<16x32xf32>
    %121 = arith.subf %104, %120 : vector<16x32xf32>
    %cst_44 = arith.constant 9.99999974E-6 : f32
    %122 = vector.broadcast %cst_44 : f32 to vector<16x1xf32>
    %123 = arith.addf %119, %122 : vector<16x1xf32>
    %124 = math.rsqrt %123 : vector<16x1xf32>
    %125 = vector.broadcast %124 : vector<16x1xf32> to vector<16x32xf32>
    %126 = arith.mulf %121, %125 : vector<16x32xf32>
    %127 = vector.broadcast %106 : vector<1x32xf32> to vector<16x32xf32>
    %128 = arith.mulf %126, %127 : vector<16x32xf32>
    %129 = vector.broadcast %108 : vector<1x32xf32> to vector<16x32xf32>
    %130 = arith.addf %128, %129 : vector<16x32xf32>
    %131 = arith.truncf %130 : vector<16x32xf32> to vector<16x32xbf16>
    %c0_45 = arith.constant 0 : index
    %c0_46 = arith.constant 0 : index
    %c0_47 = arith.constant 0 : index
    %132 = vector.load %arg11[%c0_45, %c0_46, %c0_47] : memref<1x32x128xbf16, #tpu.memory_space<vmem>>, vector<1x32x128xbf16>
    %133 = vector.shape_cast %132 : vector<1x32x128xbf16> to vector<32x128xbf16>
    %cst_48 = arith.constant dense<0.000000e+00> : vector<16x128xf32>
    %134 = tpu.matmul %131, %133, %cst_48 {dimension_numbers = #tpu.dot_dimension_numbers<[1], [0], [0], [1], [0, 0, 1, 1], [], []>} : vector<16x32xbf16>, vector<32x128xbf16>, vector<16x128xf32> -> vector<16x128xf32>
    %c0_49 = arith.constant 0 : index
    %c0_50 = arith.constant 0 : index
    %c0_51 = arith.constant 0 : index
    %135 = vector.load %arg12[%c0_49, %c0_50, %c0_51] : memref<1x1x128xf32, #tpu.memory_space<vmem>>, vector<1x1x128xf32>
    %136 = vector.shape_cast %135 : vector<1x1x128xf32> to vector<1x128xf32>
    %137 = vector.broadcast %136 : vector<1x128xf32> to vector<16x128xf32>
    %138 = arith.addf %134, %137 : vector<16x128xf32>
    %139 = arith.truncf %138 : vector<16x128xf32> to vector<16x128xbf16>
    %cst_52 = arith.constant 1.703130e+00 : bf16
    %140 = vector.broadcast %cst_52 : bf16 to vector<16x128xbf16>
    %141 = arith.mulf %140, %139 : vector<16x128xbf16>
    %142 = arith.negf %141 : vector<16x128xbf16>
    %143 = math.exp %142 : vector<16x128xbf16>
    %cst_53 = arith.constant 1.000000e+00 : bf16
    %144 = vector.broadcast %cst_53 : bf16 to vector<16x128xbf16>
    %145 = arith.addf %144, %143 : vector<16x128xbf16>
    %146 = arith.divf %144, %145 : vector<16x128xbf16>
    %147 = arith.mulf %139, %146 : vector<16x128xbf16>
    %c0_54 = arith.constant 0 : index
    %c0_55 = arith.constant 0 : index
    %c0_56 = arith.constant 0 : index
    %148 = vector.load %arg13[%c0_54, %c0_55, %c0_56] : memref<1x128x32xbf16, #tpu.memory_space<vmem>>, vector<1x128x32xbf16>
    %149 = vector.shape_cast %148 : vector<1x128x32xbf16> to vector<128x32xbf16>
    %cst_57 = arith.constant dense<0.000000e+00> : vector<16x32xf32>
    %150 = tpu.matmul %147, %149, %cst_57 {dimension_numbers = #tpu.dot_dimension_numbers<[1], [0], [0], [1], [0, 0, 1, 1], [], []>} : vector<16x128xbf16>, vector<128x32xbf16>, vector<16x32xf32> -> vector<16x32xf32>
    %c0_58 = arith.constant 0 : index
    %c0_59 = arith.constant 0 : index
    %c0_60 = arith.constant 0 : index
    %151 = vector.load %arg14[%c0_58, %c0_59, %c0_60] : memref<1x1x32xf32, #tpu.memory_space<vmem>>, vector<1x1x32xf32>
    %152 = vector.shape_cast %151 : vector<1x1x32xf32> to vector<1x32xf32>
    %153 = vector.broadcast %152 : vector<1x32xf32> to vector<16x32xf32>
    %154 = arith.addf %150, %153 : vector<16x32xf32>
    %155 = arith.addf %104, %154 : vector<16x32xf32>
    %c0_61 = arith.constant 0 : index
    %c0_62 = arith.constant 0 : index
    %156 = vector.load %arg15[%c0_61, %c0_62] : memref<16x32xf32, #tpu.memory_space<vmem>>, vector<16x32xf32>
    tpu.vector_store %arg15[%c0_61, %c0_62], %155 {strides = array<i32>} : memref<16x32xf32, #tpu.memory_space<vmem>>, vector<16x32xf32>,
    return
  }
  func.func @transform_1(%arg0: i32, %arg1: i32) -> (i32, i32, i32) {
    %c0_i32 = arith.constant 0 : i32
    %c0_i32_0 = arith.constant 0 : i32
    %c0_i32_1 = arith.constant 0 : i32
    return %arg1, %c0_i32, %c0_i32_0 : i32, i32, i32
  }
  func.func @transform_2(%arg0: i32, %arg1: i32) -> (i32, i32, i32) {
    %c0_i32 = arith.constant 0 : i32
    %c0_i32_0 = arith.constant 0 : i32
    %c0_i32_1 = arith.constant 0 : i32
    return %arg1, %c0_i32, %c0_i32_0 : i32, i32, i32
  }
  func.func @transform_3(%arg0: i32, %arg1: i32) -> (i32, i32, i32) {
    %c0_i32 = arith.constant 0 : i32
    %c0_i32_0 = arith.constant 0 : i32
    %c0_i32_1 = arith.constant 0 : i32
    return %arg1, %c0_i32, %c0_i32_0 : i32, i32, i32
  }
  func.func @transform_4(%arg0: i32, %arg1: i32) -> (i32, i32, i32) {
    %c0_i32 = arith.constant 0 : i32
    %c0_i32_0 = arith.constant 0 : i32
    %c0_i32_1 = arith.constant 0 : i32
    return %arg1, %c0_i32, %c0_i32_0 : i32, i32, i32
  }
  func.func @transform_5(%arg0: i32, %arg1: i32) -> (i32, i32, i32) {
    %c0_i32 = arith.constant 0 : i32
    %c0_i32_0 = arith.constant 0 : i32
    %c0_i32_1 = arith.constant 0 : i32
    return %arg1, %c0_i32, %c0_i32_0 : i32, i32, i32
  }
  func.func @transform_6(%arg0: i32, %arg1: i32) -> (i32, i32, i32) {
    %c0_i32 = arith.constant 0 : i32
    %c0_i32_0 = arith.constant 0 : i32
    %c0_i32_1 = arith.constant 0 : i32
    return %arg1, %c0_i32, %c0_i32_0 : i32, i32, i32
  }
  func.func @transform_7(%arg0: i32, %arg1: i32) -> (i32, i32, i32) {
    %c0_i32 = arith.constant 0 : i32
    %c0_i32_0 = arith.constant 0 : i32
    %c0_i32_1 = arith.constant 0 : i32
    return %arg1, %c0_i32, %c0_i32_0 : i32, i32, i32
  }
  func.func @transform_8(%arg0: i32, %arg1: i32) -> (i32, i32, i32) {
    %c0_i32 = arith.constant 0 : i32
    %c0_i32_0 = arith.constant 0 : i32
    %c0_i32_1 = arith.constant 0 : i32
    return %arg1, %c0_i32, %c0_i32_0 : i32, i32, i32
  }
  func.func @transform_9(%arg0: i32, %arg1: i32) -> (i32, i32, i32) {
    %c0_i32 = arith.constant 0 : i32
    %c0_i32_0 = arith.constant 0 : i32
    %c0_i32_1 = arith.constant 0 : i32
    return %arg1, %c0_i32, %c0_i32_0 : i32, i32, i32
  }
  func.func @transform_10(%arg0: i32, %arg1: i32) -> (i32, i32, i32) {
    %c0_i32 = arith.constant 0 : i32
    %c0_i32_0 = arith.constant 0 : i32
    %c0_i32_1 = arith.constant 0 : i32
    return %arg1, %c0_i32, %c0_i32_0 : i32, i32, i32
  }
  func.func @transform_11(%arg0: i32, %arg1: i32) -> (i32, i32, i32) {
    %c0_i32 = arith.constant 0 : i32
    %c0_i32_0 = arith.constant 0 : i32
    %c0_i32_1 = arith.constant 0 : i32
    return %arg1, %c0_i32, %c0_i32_0 : i32, i32, i32
  }
  func.func @transform_12(%arg0: i32, %arg1: i32) -> (i32, i32, i32) {
    %c0_i32 = arith.constant 0 : i32
    %c0_i32_0 = arith.constant 0 : i32
    %c0_i32_1 = arith.constant 0 : i32
    return %arg1, %c0_i32, %c0_i32_0 : i32, i32, i32
  }
  func.func @transform_13(%arg0: i32, %arg1: i32) -> (i32, i32) {
    %c0_i32 = arith.constant 0 : i32
    %c0_i32_0 = arith.constant 0 : i32
    return %arg0, %c0_i32 : i32, i32
  }
}

</mosaic_0001>

<bundles_post_ra>
// kernel: tpu_custom_call.1
= control target key start
LH: loop header
LB: loop body
LE: loop exit
PB: predicated region body
PF: predicated region fallthrough
CT: control target
= control target key end

     0   :  { %s3547_s0 = inlined_call_operand.hbm [shape: f32[16,32], index: 0, kind: input, shape index: {}, may-alias: {0,13}]   ;;  %s3548_s1 = inlined_call_operand.vmem [shape: f32[2,1,32], index: 1, kind: input, shape index: {}]   ;;  %s3549_s2 = inlined_call_operand.vmem [shape: f32[2,1,32], index: 2, kind: input, shape index: {}]   ;;  %s3550_s3 = inlined_call_operand.vmem [shape: bf16[2,32,96], index: 3, kind: input, shape index: {}]   ;;  %s3551_s4 = inlined_call_operand.vmem [shape: f32[2,1,96], index: 4, kind: input, shape index: {}]   ;;  %s3552_s5 = inlined_call_operand.vmem [shape: bf16[2,32,32], index: 5, kind: input, shape index: {}]   ;;  %s3553_s6 = inlined_call_operand.vmem [shape: f32[2,1,32], index: 6, kind: input, shape index: {}]   ;;  %s3554_s7 = inlined_call_operand.vmem [shape: f32[2,1,32], index: 7, kind: input, shape index: {}]   ;;  %s3555_s8 = inlined_call_operand.vmem [shape: f32[2,1,32], index: 8, kind: input, shape index: {}]   ;;  %s3556_s9 = inlined_call_operand.vmem [shape: bf16[2,32,128], index: 9, kind: input, shape index: {}]   ;;  %s3557_s10 = inlined_call_operand.vmem [shape: f32[2,1,128], index: 10, kind: input, shape index: {}]   ;;  %s3558_s11 = inlined_call_operand.vmem [shape: bf16[2,128,32], index: 11, kind: input, shape index: {}]   ;;  %s3559_s12 = inlined_call_operand.vmem [shape: f32[2,1,32], index: 12, kind: input, shape index: {}]   ;;  %s3560_s13 = inlined_call_operand.hbm [shape: f32[16,32], index: 13, kind: output, shape index: {}, may-alias: {0,13}]  }
   0x1   :  { %3564 = sst [smem:[#allocation15_spill]] %s3550_s3 }
   0x2   :  { %3565 = sst [smem:[#allocation16_spill]] %s3552_s5 }
   0x3   :  { %3566 = sst [smem:[#allocation17_spill]] %s3560_s13 }
   0x4   :  { %18 = vsyncpa [#allocation3], 0  ;;  %s2957_s25 = smov 0   ;;  %s2959_s26 = smov 0  }
   0x5   :  { %s2961_s27 = smov 0  }
   0x6 LB: > { %3567 = sst [smem:[#allocation11_spill]] %s2866_s26  ;;  %s33_s29 = sadd.s32 1, %s2866_s26  ;;  %s2870_s27 = sphi %s2961_s27, %s24_s27   ;;  %s2866_s26 = sphi %s2959_s26, %s3583_s26   ;;  %s2862_s25 = sphi %s2957_s25, %s3582_s25  }
   0x7   : > { %3568 = sst [smem:[#allocation12_spill]] %s2870_s27  ;;  %p34_p0 = scmp.ge.s32.totalorder %s33_s29, 2 }
   0x8   : > { %p2574_p1 = scmp.ge.s32.totalorder %s2870_s27, 1  ;;  %p470_p2 = scmp.lt.s32.totalorder %s2870_s27, 3 }
   0x9   : > { %s3585_s29 = smov (%p34_p0, %s33_s29), 0 }
   0xa   : > { %3569 = sst [smem:[#allocation13_spill]] %s3585_s29  ;;  %p471_p3 = pnand %p2574_p1, %p470_p2 }
   0xc   : > { %474 = sbr.rel (%p471_p3) target bundleno = 2540 (0x9ec), region = 68 }
  0x11   : > { %p546_p4 = scmp.lt.s32.totalorder %s2862_s25, 1  ;;  %s3570_s3 = sld [smem:[#allocation15_spill]] }
  0x12   : > { %s3571_s5 = sld [smem:[#allocation16_spill]]  ;;  %p2583_p5 = scmp.ne.s32.totalorder %s2862_s25, 0 }
  0x13   : > { %s2976_s30 = scalar_select %p546_p4, %s2862_s25, 1 }
  0x15   : > { %s2663_s20 = sshll.u32 %s2976_s30, 4  ;;  %s570_s27 = scalar_lea.vmem %s3554_s7, %s2976_s30 }
  0x16   : > { %s573_s23 = scalar_lea.vmem %s3555_s8, %s2976_s30  ;;  %s589_s21 = scalar_lea.vmem %s3559_s12, %s2976_s30 }
  0x17   : > { %s2994_s15 = scalar_lea.vmem %s3570_s3, %s2663_s20  ;;  %s3016_s3 = scalar_lea.vmem %s3556_s9, %s2663_s20 }
  0x18   : > { %s2999_s26 = scalar_lea.vmem %s3571_s5, %s2663_s20  ;;  %s581_s5 = scalar_lea.vmem %s3557_s10, %s2976_s30 }
  0x19   : > { %3572 = sst [smem:[#allocation14_spill]] %s2999_s26  ;;  %s2666_s26 = sshll.u32 %s2976_s30, 6 }
  0x1a   : > { %s3026_s17 = scalar_lea.vmem %s3558_s11, %s2666_s26  ;;  %596 = sbr.rel (%p2583_p5) target bundleno = 36 (0x24), region = 72 }
  0x1f   : > { %s606_s20 = sshll.u32 %s3547_s0, 4  ;;  %s2872_s14 = smov [#allocation2]   ;;  %s607_s20 = int_to_ptr.hbm [resolvable:$true] %s606_s20 }
  0x20   : > { %s608_s28 = sshll.u32 %s2872_s14, 4  ;;  %s609_s28 = int_to_ptr.vmem [resolvable:$true] %s608_s28 }
  0x21   : > { %611 = dma.hbm_to_vmem [thread:$0]  %s607_s20, 256, %s609_s28, [#allocation4] }
  0x22   : > { %2854 = dma.done.wait [#allocation4], 256 }
  0x23   : > { %2855 = vsyncadd [#allocation4], 4294967040 }
  0x24 PF: > { %v615_v0 = vld [vmem:[#allocation2] sm:$0xff]  ;;  %vm619_vm0 = vcmask 261120   ;;  %v616_v2 = vld [vmem:[#allocation2 + $0x8] sm:$0xff]  ;;  %v2873_v4 = vmov 32.0   ;;  %s3574_s16 = scalar_lea.vmem %s3549_s2, %s2976_s30  ;;  %s3575_s22 = scalar_lea.vmem %s3551_s4, %s2976_s30  ;;  %vm750_vm8 = vcmask 1047556   ;;  %vm1086_vm9 = vcmask 64512  }
  0x25   : > { %v620_v1 = vsel %vm619_vm0, %v615_v0, 0.0  ;;  %v623_v3 = vsel %vm619_vm0, %v616_v2, 0.0  ;;  %2734 = vrcp.f32 %v2873_v4  ;;  %v2668_v21 = vld [vmem:[%s2994_s15 + $0x8] sm:$0xff]  ;;  %v2667_v23 = vld [vmem:[%s2994_s15] sm:$0xff]  ;;  %s3573_s15 = scalar_lea.vmem %s3548_s1, %s2976_s30  ;;  %s2874_s24 = smov 96   ;;  %vm1214_vm10 = vcmask 1043456  }
  0x26   : > { %621 = vadd.xlane.f32.xlu0 %v620_v1  ;;  %711 = vmatpush.bf16.msra.mxu0 %v2668_v21  ;;  %v2726_v42 = vld [vmem:[%s3573_s15] ss:$0 sm:$0xff]  ;;  %s2875_s20 = smov 104   ;;  %s2876_s14 = smov 120   ;;  %vm1424_vm11 = vcmask 195584   ;;  %vm1421_vm12 = vcmask 130048  }
  0x27   : > { %v2727_v47 = vld [vmem:[%s3574_s16] ss:$0 sm:$0xff]  ;;  %s2877_s28 = smov 112   ;;  %s2878_s25 = smov 64  }
  0x28   : > { %v2728_v52 = vld [vmem:[%s3575_s22] ss:$0 sm:$0xff]  ;;  %s2881_s26 = smov 8   ;;  %s3576_s15 = sld [smem:[#allocation14_spill]] }
  0x29   : > { %s2882_s29 = smov 16   ;;  %s2883_s13 = smov 24  }
  0x2a   : > { %712 = vmatpush.bf16.msra.mxu0 %v2667_v23  ;;  %s3577_s18 = scalar_lea.vmem %s3553_s6, %s2976_s30  ;;  %s2886_s30 = smov 128  }
  0x2b   : > { %v2735_v5 = vpop.eup %2734 }
  0x2c   : > { %v627_v6 = vmul.f32 32.0, %v2735_v5  ;;  %vm631_vm1 = vweird.f32 %v2735_v5 }
  0x2e   : > { %624 = vadd.xlane.f32.xlu0 %v623_v3  ;;  %v628_v7 = vsub.f32 1.0, %v627_v6 }
  0x30   : > { %v629_v8 = vmul.f32 %v2735_v5, %v628_v7 }
  0x32   : > { %v630_v9 = vadd.f32 %v2735_v5, %v629_v8 }
  0x34   : > { %v3037_v10 = vsel %vm631_vm1, %v2735_v5, %v630_v9 }
  0x99   : > { %v622_v11 = vpop.xlane.xlu0 %621 }
  0x9a   : > { %v633_v12 = vmul.f32 %v3037_v10, %v622_v11 }
  0x9c   : > { %v635_v13 = vsub.f32 %v615_v0, %v633_v12  ;;  %v2879_v0 = vmov 1983009808  }
  0x9d   : > { %v741_v1 = vunpack.c.l.s4 %v2879_v0 }
  0x9e   : > { %v637_v14 = vmul.f32 %v635_v13, %v635_v13 }
  0x9f   : > { %v3080_v5 = vunpack.c.0.s8 %v741_v1 }
  0xa0   : > { %v639_v15 = vsel %vm619_vm0, %v637_v14, 0.0 }
  0xa1   : > { %640 = vadd.xlane.f32.xlu1 %v639_v15  ;;  %v625_v16 = vpop.xlane.xlu0 %624  ;;  %v2880_v15 = vmov 1934713408  }
  0xa2   : > { %v634_v17 = vmul.f32 %v3037_v10, %v625_v16  ;;  %v755_v16 = vunpack.c.l.s4 %v2880_v15 }
  0xa4   : > { %v636_v18 = vsub.f32 %v616_v2, %v634_v17  ;;  %v3086_v21 = vunpack.c.0.s8 %v755_v16 }
  0xa6   : > { %v638_v19 = vmul.f32 %v636_v18, %v636_v18 }
  0xa8   : > { %v642_v20 = vsel %vm619_vm0, %v638_v19, 0.0 }
  0xa9   : > { %643 = vadd.xlane.f32.xlu1 %v642_v20 }
 0x114   : > { %v641_v22 = vpop.xlane.xlu1 %640 }
 0x115   : > { %v645_v24 = vmul.f32 %v641_v22, %v3037_v10 }
 0x117   : > { %v647_v25 = vadd.f32 1e-05, %v645_v24 }
 0x119   : > { %2736 = vrsqrt.f32 %v647_v25  ;;  %vm655_vm3 = vweird.f32 %v647_v25 }
 0x11c   : > { %v644_v26 = vpop.xlane.xlu1 %643 }
 0x11d   : > { %v646_v27 = vmul.f32 %v644_v26, %v3037_v10 }
 0x11f   : > { %v2737_v28 = vpop.eup %2736  ;;  %v648_v29 = vadd.f32 1e-05, %v646_v27 }
 0x120   : > { %v650_v30 = vmul.f32 %v2737_v28, %v647_v25  ;;  %vm656_vm2 = vweird.f32 %v2737_v28 }
 0x121   : > { %2738 = vrsqrt.f32 %v648_v29  ;;  %vm657_vm4 = vmor %vm655_vm3, %vm656_vm2  ;;  %vm665_vm6 = vweird.f32 %v648_v29 }
 0x122   : > { %v651_v31 = vmul.f32 %v2737_v28, %v650_v30 }
 0x124   : > { %v652_v32 = vmul.f32 0.5, %v651_v31 }
 0x126   : > { %v653_v33 = vsub.f32 1.5, %v652_v32 }
 0x127   : > { %v2739_v34 = vpop.eup %2738 }
 0x128   : > { %v654_v35 = vmul.f32 %v2737_v28, %v653_v33  ;;  %v660_v36 = vmul.f32 %v2739_v34, %v648_v29  ;;  %vm666_vm5 = vweird.f32 %v2739_v34 }
 0x129   : > { %vm667_vm7 = vmor %vm665_vm6, %vm666_vm5 }
 0x12a   : > { %v661_v37 = vmul.f32 %v2739_v34, %v660_v36  ;;  %v658_v38 = vsel %vm657_vm4, %v2737_v28, %v654_v35 }
 0x12b   : > { %v669_v41 = vmul.f32 %v658_v38, %v635_v13 }
 0x12c   : > { %v662_v39 = vmul.f32 0.5, %v661_v37 }
 0x12d   : > { %v674_v46 = vmul.f32 %v2726_v42, %v669_v41 }
 0x12e   : > { %v663_v40 = vsub.f32 1.5, %v662_v39 }
 0x12f   : > { %v679_v49 = vadd.f32 %v2727_v47, %v674_v46 }
 0x130   : > { %v664_v43 = vmul.f32 %v2739_v34, %v663_v40 }
 0x132   : > { %v668_v44 = vsel %vm667_vm7, %v2739_v34, %v664_v43 }
 0x133   : > { %v670_v45 = vmul.f32 %v668_v44, %v636_v18 }
 0x135   : > { %v675_v48 = vmul.f32 %v2726_v42, %v670_v45 }
 0x137   : > { %v680_v50 = vadd.f32 %v2727_v47, %v675_v48 }
 0x139   : > { %v681_v51 = vpack.c.bf16 %v680_v50, %v679_v49 }
 0x13b   : > { %2592 = vmatmul.msk.bf16.vlgmr.msra.gmra.mxu0 %vm619_vm0, %v681_v51 }
 0x1b8   : > { %v714_v53 = vpop.f32.mrf.mxu0 }
 0x1b9   : > { %v715_v54 = vadd.f32 %v2728_v52, %v714_v53 }
 0x1bb   : > { %v719_v55 = vpack.c.bf16 %v715_v54, %v715_v54 }
 0x1bd   : > { %792 = vrot.lane.b32.xlu1 %v719_v55, %s2874_s24  ;;  %725 = vrot.lane.b32.xlu0 %v719_v55, %s2875_s20  ;;  %v730_v3 = vshrl.u32 %v719_v55, 16 }
 0x1be   : > { %721 = vrot.lane.b32.xlu2 %v719_v55, %s2876_s14 }
 0x1c0   : > { %v716_v56 = vpop.f32.mrf.mxu0 }
 0x1c1   : > { %v717_v57 = vadd.f32 %v2728_v52, %v716_v56 }
 0x1c3   : > { %v3064_v58 = vpack.c.bf16 %v717_v57, %v717_v57 }
 0x1c5   : > { %1429 = vrot.lane.b32.xlu1 %v3064_v58, %s2876_s14 }
 0x1c6   : > { %723 = vrot.lane.b32.xlu2 %v719_v55, %s2877_s28 }
 0x1cd   : > { %1431 = vrot.lane.b32.xlu1 %v3064_v58, %s2877_s28  ;;  %s2885_s28 = smov [#allocation2]  }
 0x1d5   : > { %1433 = vrot.lane.b32.xlu1 %v3064_v58, %s2875_s20 }
 0x218   : > { %v722_v59 = vpop.permute.xlu2 %721 }
 0x219   : > { %866 = vrot.lane.b32.xlu0 %v722_v59, %s2878_s25  ;;  %794 = vrot.lane.b32.xlu2 %v722_v59, %s2874_s24  ;;  %v731_v2 = vshrl.u32 %v722_v59, 16  ;;  %v729_v6 = vpack.i.b16 %v722_v59, %v719_v55 }
 0x21b   : > { %v732_v7 = vpack.i.b16 %v731_v2, %v730_v3  ;;  %v743_v12 = vperm.slane %v729_v6, %v3080_v5 }
 0x21d   : > { %v770_v14 = vperm.slane %v732_v7, %v3080_v5  ;;  %v752_v19 = vrot.slane %v743_v12, 4 }
 0x21f   : > { %v778_v20 = vrot.slane %v770_v14, 4 }
 0x220   : > { %v724_v60 = vpop.permute.xlu2 %723 }
 0x221   : > { %796 = vrot.lane.b32.xlu2 %v724_v60, %s2874_s24  ;;  %v736_v8 = vshrl.u32 %v724_v60, 16 }
 0x22f   : > { %v726_v61 = vpop.permute.xlu0 %725  ;;  %v793_v62 = vpop.permute.xlu1 %792 }
 0x230   : > { %870 = vrot.lane.b32.xlu0 %v726_v61, %s2878_s25  ;;  %798 = vrot.lane.b32.xlu2 %v726_v61, %s2874_s24  ;;  %v737_v4 = vshrl.u32 %v726_v61, 16  ;;  %v735_v9 = vpack.i.b16 %v726_v61, %v724_v60  ;;  %v803_v32 = vshrl.u32 %v793_v62, 16 }
 0x232   : > { %v738_v11 = vpack.i.b16 %v737_v4, %v736_v8  ;;  %v748_v17 = vperm.slane %v735_v9, %v3080_v5 }
 0x234   : > { %v775_v18 = vperm.slane %v738_v11, %v3080_v5  ;;  %v749_v22 = vrot.slane %v748_v17, 4  ;;  %v753_v23 = vsel %vm750_vm8, %v748_v17, %v752_v19 }
 0x235   : > { %v761_v26 = vperm.slane %v753_v23, %v3086_v21 }
 0x236   : > { %v776_v24 = vrot.slane %v775_v18, 4  ;;  %v779_v25 = vsel %vm750_vm8, %v775_v18, %v778_v20  ;;  %v751_v27 = vsel %vm750_vm8, %v749_v22, %v743_v12 }
 0x237   : > { %v3076_v63 = vpop.permute.xlu1 %1429  ;;  %v787_v28 = vperm.slane %v779_v25, %v3086_v21  ;;  %v757_v33 = vperm.slane %v751_v27, %v3086_v21  ;;  %v764_v34 = vrot.slane %v761_v26, 4 }
 0x238   : > { %864 = vrot.lane.b32.xlu2 %v719_v55, %s2878_s25  ;;  %v777_v30 = vsel %vm750_vm8, %v776_v24, %v770_v14 }
 0x239   : > { %v783_v36 = vperm.slane %v777_v30, %v3086_v21  ;;  %v790_v37 = vrot.slane %v787_v28, 4  ;;  %v762_v39 = vrot.slane %v757_v33, 4  ;;  %v765_v40 = vsel %vm750_vm8, 0, %v764_v34 }
 0x23a   : > { %v941_v49 = vrot.slane %v765_v40, 4  ;;  %v936_v22 = vsel %vm750_vm8, %v764_v34, %v757_v33 }
 0x23b   : > { %v788_v42 = vrot.slane %v783_v36, 4  ;;  %v791_v43 = vsel %vm750_vm8, 0, %v790_v37  ;;  %v763_v53 = vsel %vm750_vm8, 0, %v762_v39  ;;  %v955_v30 = vsel %vm750_vm8, %v790_v37, %v783_v36 }
 0x23c   : > { %v960_v54 = vrot.slane %v791_v43, 4  ;;  %v959_v43 = vperm.slane %v955_v30, %v3080_v5 }
 0x23d   : > { %v789_v55 = vsel %vm750_vm8, 0, %v788_v42 }
 0x23e   : > { %v961_v7 = vsel %vm750_vm8, %v960_v54, %v789_v55 }
 0x23f   : > { %v965_v17 = vperm.slane %v961_v7, %v3080_v5 }
 0x240   : > { %868 = vrot.lane.b32.xlu2 %v724_v60, %s2878_s25 }
 0x241   : > { %v966_v33 = vrot.slane %v965_v17, 4 }
 0x248   : > { %1501 = vrot.lane.b32.xlu2 %v3076_v63, %s2874_s24 }
 0x273   : > { %v795_v13 = vpop.permute.xlu2 %794 }
 0x274   : > { %v804_v31 = vshrl.u32 %v795_v13, 16  ;;  %v802_v35 = vpack.i.b16 %v795_v13, %v793_v62  ;;  %v942_v62 = vsel %vm750_vm8, %v941_v49, %v763_v53 }
 0x275   : > { %v946_v9 = vperm.slane %v942_v62, %v3080_v5 }
 0x276   : > { %v805_v38 = vpack.i.b16 %v804_v31, %v803_v32  ;;  %v816_v41 = vperm.slane %v802_v35, %v3080_v5  ;;  %v940_v35 = vperm.slane %v936_v22, %v3080_v5 }
 0x277   : > { %v947_v26 = vrot.slane %v946_v9, 4 }
 0x278   : > { %v842_v45 = vperm.slane %v805_v38, %v3080_v5  ;;  %v824_v50 = vrot.slane %v816_v41, 4 }
 0x279   : > { %v948_v42 = vsel %vm750_vm8, %v947_v26, %v940_v35 }
 0x27a   : > { %v850_v56 = vrot.slane %v842_v45, 4 }
 0x27b   : > { %v797_v29 = vpop.permute.xlu2 %796 }
 0x27c   : > { %v809_v46 = vshrl.u32 %v797_v29, 16 }
 0x28a   : > { %v799_v44 = vpop.permute.xlu2 %798 }
 0x28b   : > { %v808_v47 = vpack.i.b16 %v799_v44, %v797_v29  ;;  %v810_v48 = vshrl.u32 %v799_v44, 16  ;;  %v867_v27 = vpop.permute.xlu0 %866 }
 0x28d   : > { %v811_v51 = vpack.i.b16 %v810_v48, %v809_v46  ;;  %v821_v52 = vperm.slane %v808_v47, %v3080_v5  ;;  %v967_v47 = vsel %vm750_vm8, %v966_v33, %v959_v43 }
 0x28e   : > { %v971_v55 = vperm.slane %v967_v47, %v3086_v21 }
 0x28f   : > { %v822_v57 = vrot.slane %v821_v52, 4  ;;  %v825_v59 = vsel %vm750_vm8, %v821_v52, %v824_v50  ;;  %v847_v60 = vperm.slane %v811_v51, %v3080_v5  ;;  %v952_v50 = vperm.slane %v948_v42, %v3086_v21 }
 0x290   : > { %v833_v61 = vperm.slane %v825_v59, %v3086_v21 }
 0x291   : > { %v823_v0 = vsel %vm750_vm8, %v822_v57, %v816_v41  ;;  %v848_v1 = vrot.slane %v847_v60, 4  ;;  %v851_v2 = vsel %vm750_vm8, %v847_v60, %v850_v56  ;;  %v876_v41 = vshrl.u32 %v867_v27, 16 }
 0x292   : > { %v829_v3 = vperm.slane %v823_v0, %v3086_v21  ;;  %v836_v4 = vrot.slane %v833_v61, 4  ;;  %v859_v6 = vperm.slane %v851_v2, %v3086_v21  ;;  %v865_v16 = vpop.permute.xlu2 %864 }
 0x293   : > { %v849_v8 = vsel %vm750_vm8, %v848_v1, %v842_v45  ;;  %v875_v34 = vshrl.u32 %v865_v16, 16  ;;  %v874_v44 = vpack.i.b16 %v867_v27, %v865_v16  ;;  %v953_v1 = vrot.slane %v952_v50, 4 }
 0x294   : > { %v834_v11 = vrot.slane %v829_v3, 4  ;;  %v837_v12 = vsel %vm750_vm8, 0, %v836_v4  ;;  %v855_v13 = vperm.slane %v849_v8, %v3086_v21  ;;  %v862_v14 = vrot.slane %v859_v6, 4 }
 0x295   : > { %v991_v15 = vrot.slane %v837_v12, 4  ;;  %v986_v24 = vsel %vm750_vm8, %v836_v4, %v829_v3  ;;  %v877_v48 = vpack.i.b16 %v876_v41, %v875_v34  ;;  %v888_v54 = vperm.slane %v874_v44, %v3080_v5 }
 0x296   : > { %v835_v18 = vsel %vm750_vm8, 0, %v834_v11  ;;  %v860_v19 = vrot.slane %v855_v13, 4  ;;  %v863_v20 = vsel %vm750_vm8, 0, %v862_v14  ;;  %v1005_v31 = vsel %vm750_vm8, %v862_v14, %v855_v13 }
 0x297   : > { %v1010_v23 = vrot.slane %v863_v20, 4  ;;  %v992_v25 = vsel %vm750_vm8, %v991_v15, %v835_v18  ;;  %v990_v38 = vperm.slane %v986_v24, %v3080_v5  ;;  %v1009_v37 = vperm.slane %v1005_v31, %v3080_v5 }
 0x298   : > { %v861_v28 = vsel %vm750_vm8, 0, %v860_v19  ;;  %v996_v29 = vperm.slane %v992_v25, %v3080_v5  ;;  %v914_v60 = vperm.slane %v877_v48, %v3080_v5  ;;  %v896_v7 = vrot.slane %v888_v54, 4 }
 0x299   : > { %v1011_v32 = vsel %vm750_vm8, %v1010_v23, %v861_v28  ;;  %v972_v11 = vrot.slane %v971_v55, 4  ;;  %v978_v19 = vshrl.u32 %v971_v55, 16  ;;  %v977_v27 = vshrl.u32 %v952_v50, 16 }
 0x29a   : > { %v997_v39 = vrot.slane %v996_v29, 4  ;;  %v1015_v40 = vperm.slane %v1011_v32, %v3080_v5  ;;  %v869_v51 = vpop.permute.xlu2 %868  ;;  %v922_v16 = vrot.slane %v914_v60, 4  ;;  %v976_v32 = vpack.i.b16 %v971_v55, %v952_v50 }
 0x29b   : > { %v881_v61 = vshrl.u32 %v869_v51, 16  ;;  %v973_v28 = vsel %vm750_vm8, 0, %v972_v11  ;;  %v954_v41 = vsel %vm750_vm8, 0, %v953_v1 }
 0x29c   : > { %v998_v36 = vsel %vm750_vm8, %v997_v39, %v990_v38  ;;  %v1016_v45 = vrot.slane %v1015_v40, 4  ;;  %v979_v40 = vpack.i.b16 %v978_v19, %v977_v27  ;;  %v984_v42 = vshrl.u32 %v973_v28, 16 }
 0x29d   : > { %v1002_v46 = vperm.slane %v998_v36, %v3086_v21  ;;  %v983_v50 = vshrl.u32 %v954_v41, 16 }
 0x29e   : > { %v1017_v49 = vsel %vm750_vm8, %v1016_v45, %v1009_v37 }
 0x29f   : > { %v1021_v52 = vperm.slane %v1017_v49, %v3086_v21  ;;  %v1003_v53 = vrot.slane %v1002_v46, 4  ;;  %v1027_v0 = vshrl.u32 %v1002_v46, 16 }
 0x2a1   : > { %v1026_v56 = vpack.i.b16 %v1021_v52, %v1002_v46  ;;  %v1028_v57 = vshrl.u32 %v1021_v52, 16  ;;  %v1022_v59 = vrot.slane %v1021_v52, 4  ;;  %v1004_v6 = vsel %vm750_vm8, 0, %v1003_v53 }
 0x2a2   : > { %v871_v62 = vpop.permute.xlu0 %870  ;;  %v1033_v18 = vshrl.u32 %v1004_v6, 16  ;;  %v982_v46 = vpack.i.b16 %v973_v28, %v954_v41 }
 0x2a3   : > { %v880_v2 = vpack.i.b16 %v871_v62, %v869_v51  ;;  %v882_v3 = vshrl.u32 %v871_v62, 16  ;;  %v1091_v4 = vsel %vm1086_vm9, %v1026_v56, 0  ;;  %v1029_v8 = vpack.i.b16 %v1028_v57, %v1027_v0 }
 0x2a4   : > { %1100 = vmatpush.bf16.xpose.msra.mxu1 %v1091_v4  ;;  %v1023_v9 = vsel %vm750_vm8, 0, %v1022_v59 }
 0x2a5   : > { %v883_v12 = vpack.i.b16 %v882_v3, %v881_v61  ;;  %v893_v13 = vperm.slane %v880_v2, %v3080_v5  ;;  %v1032_v14 = vpack.i.b16 %v1023_v9, %v1004_v6  ;;  %v1034_v15 = vshrl.u32 %v1023_v9, 16 }
 0x2a6   : > { %v1110_v17 = vsel %vm1086_vm9, %v1029_v8, 0 }
 0x2a7   : > { %v894_v20 = vrot.slane %v893_v13, 4  ;;  %v897_v22 = vsel %vm750_vm8, %v893_v13, %v896_v7  ;;  %v919_v23 = vperm.slane %v883_v12, %v3080_v5  ;;  %1119 = vmatpush.bf16.xpose.msra.mxu2 %v1110_v17  ;;  %v1129_v24 = vsel %vm1086_vm9, %v1032_v14, 0 }
 0x2a8   : > { %v905_v25 = vperm.slane %v897_v22, %v3086_v21  ;;  %1138 = vmatpush.bf16.xpose.msra.mxu3 %v1129_v24  ;;  %v1035_v26 = vpack.i.b16 %v1034_v15, %v1033_v18 }
 0x2a9   : > { %v895_v29 = vsel %vm750_vm8, %v894_v20, %v888_v54  ;;  %v920_v30 = vrot.slane %v919_v23, 4  ;;  %v923_v31 = vsel %vm750_vm8, %v919_v23, %v922_v16  ;;  %v985_v54 = vpack.i.b16 %v984_v42, %v983_v50 }
 0x2aa   : > { %v901_v35 = vperm.slane %v895_v29, %v3086_v21  ;;  %v908_v33 = vrot.slane %v905_v25, 4  ;;  %v931_v34 = vperm.slane %v923_v31, %v3086_v21  ;;  %v1148_v38 = vsel %vm1086_vm9, %v1035_v26, 0 }
 0x2ab   : > { %v921_v39 = vsel %vm750_vm8, %v920_v30, %v914_v60  ;;  %1157 = vmatpush.bf16.xpose.msrb.mxu0 %v1148_v38  ;;  %2593 = vmatmul.msk.bf16.vlgmr.msra.gmra.mxu1 %vm1086_vm9, %v976_v32 }
 0x2ac   : > { %v906_v43 = vrot.slane %v901_v35, 4  ;;  %v909_v44 = vsel %vm750_vm8, 0, %v908_v33  ;;  %v927_v36 = vperm.slane %v921_v39, %v3086_v21  ;;  %v934_v37 = vrot.slane %v931_v34, 4  ;;  %v3190_v39 = vpop.permute.xlu1 %1431 }
 0x2ad   : > { %v1041_v45 = vrot.slane %v909_v44, 4  ;;  %v1036_v52 = vsel %vm750_vm8, %v908_v33, %v901_v35 }
 0x2ae   : > { %v907_v47 = vsel %vm750_vm8, 0, %v906_v43  ;;  %v932_v48 = vrot.slane %v927_v36, 4  ;;  %v935_v49 = vsel %vm750_vm8, 0, %v934_v37  ;;  %2594 = vmatmul.msk.bf16.vlgmr.msra.gmra.mxu2 %vm1086_vm9, %v979_v40  ;;  %v1055_v57 = vsel %vm750_vm8, %v934_v37, %v927_v36  ;;  %v1502_v43 = vpop.permute.xlu2 %1501 }
 0x2af   : > { %v1060_v51 = vrot.slane %v935_v49, 4  ;;  %2595 = vmatmul.msk.bf16.vlgmr.msra.gmra.mxu3 %vm1086_vm9, %v982_v46  ;;  %v1042_v53 = vsel %vm750_vm8, %v1041_v45, %v907_v47  ;;  %v1040_v60 = vperm.slane %v1036_v52, %v3080_v5  ;;  %v1059_v1 = vperm.slane %v1055_v57, %v3080_v5 }
 0x2b0   : > { %v933_v55 = vsel %vm750_vm8, 0, %v932_v48  ;;  %v1046_v56 = vperm.slane %v1042_v53, %v3080_v5 }
 0x2b1   : > { %v1061_v59 = vsel %vm750_vm8, %v1060_v51, %v933_v55 }
 0x2b2   : > { %2596 = vmatmul.msk.bf16.vlgmr.msrb.gmra.mxu0 %vm1086_vm9, %v985_v54  ;;  %v1047_v61 = vrot.slane %v1046_v56, 4  ;;  %v1065_v62 = vperm.slane %v1061_v59, %v3080_v5 }
 0x2b4   : > { %v1048_v0 = vsel %vm750_vm8, %v1047_v61, %v1040_v60  ;;  %v1066_v2 = vrot.slane %v1065_v62, 4  ;;  %v3194_v40 = vpop.permute.xlu1 %1433  ;;  %v1511_v61 = vshrl.u32 %v1502_v43, 16 }
 0x2b5   : > { %v1052_v3 = vperm.slane %v1048_v0, %v3086_v21 }
 0x2b6   : > { %v1067_v4 = vsel %vm750_vm8, %v1066_v2, %v1059_v1 }
 0x2b7   : > { %v1071_v6 = vperm.slane %v1067_v4, %v3086_v21  ;;  %v1053_v7 = vrot.slane %v1052_v3, 4  ;;  %v1077_v8 = vshrl.u32 %v1052_v3, 16 }
 0x2b9   : > { %v1076_v9 = vpack.i.b16 %v1071_v6, %v1052_v3  ;;  %v1078_v11 = vshrl.u32 %v1071_v6, 16  ;;  %v1054_v12 = vsel %vm750_vm8, 0, %v1053_v7  ;;  %v1072_v13 = vrot.slane %v1071_v6, 4 }
 0x2ba   : > { %v1083_v18 = vshrl.u32 %v1054_v12, 16 }
 0x2bb   : > { %v1216_v14 = vsel %vm1214_vm10, %v1076_v9, 0  ;;  %v1079_v15 = vpack.i.b16 %v1078_v11, %v1077_v8  ;;  %v1073_v16 = vsel %vm750_vm8, 0, %v1072_v13 }
 0x2bc   : > { %1225 = vmatpush.bf16.msrb.mxu1 %v1216_v14  ;;  %v1082_v17 = vpack.i.b16 %v1073_v16, %v1054_v12  ;;  %v1084_v19 = vshrl.u32 %v1073_v16, 16 }
 0x2bd   : > { %v1235_v20 = vsel %vm1214_vm10, %v1079_v15, 0 }
 0x2be   : > { %1244 = vmatpush.bf16.msrb.mxu2 %v1235_v20  ;;  %v1254_v22 = vsel %vm1214_vm10, %v1082_v17, 0  ;;  %v1085_v23 = vpack.i.b16 %v1084_v19, %v1083_v18 }
 0x2bf   : > { %1263 = vmatpush.bf16.msrb.mxu3 %v1254_v22 }
 0x2c0   : > { %v1273_v24 = vsel %vm1214_vm10, %v1085_v23, 0 }
 0x2c1   : > { %1282 = vmatpush.bf16.msra.mxu0 %v1273_v24 }
 0x328   : > { %v1102_v25 = vpop.f32.mrf.mxu1 }
 0x329   : > { %v1163_v26 = vsel %vm1086_vm9, %v1102_v25, -inf }
 0x32a   : > { %1164 = vmax.xlane.f32.xlu1 %v1163_v26 }
 0x32f   : > { %v1159_v27 = vpop.f32.mrf.mxu0 }
 0x330   : > { %v1172_v28 = vsel %vm1086_vm9, %v1159_v27, -inf  ;;  %v1104_v29 = vpop.f32.mrf.mxu1 }
 0x331   : > { %1173 = vmax.xlane.f32.xlu0 %v1172_v28  ;;  %v1121_v30 = vpop.f32.mrf.mxu2 }
 0x332   : > { %v1140_v31 = vpop.f32.mrf.mxu3  ;;  %v1166_v33 = vsel %vm1086_vm9, %v1121_v30, -inf }
 0x333   : > { %v1169_v32 = vsel %vm1086_vm9, %v1140_v31, -inf }
 0x334   : > { %1170 = vmax.xlane.f32.xlu2 %v1169_v32 }
 0x337   : > { %v1161_v35 = vpop.f32.mrf.mxu0 }
 0x339   : > { %1167 = vmax.xlane.f32.xlu0 %v1166_v33  ;;  %v1123_v34 = vpop.f32.mrf.mxu2 }
 0x33a   : > { %v1142_v38 = vpop.f32.mrf.mxu3 }
 0x343   : > { %1499 = vrot.lane.b32.xlu1 %v3064_v58, %s2874_s24 }
 0x34c   : > { %1505 = vrot.lane.b32.xlu2 %v3194_v40, %s2874_s24 }
 0x34d   : > { %1503 = vrot.lane.b32.xlu0 %v3190_v39, %s2874_s24 }
 0x39d   : > { %v1165_v41 = vpop.xlane.xlu1 %1164 }
 0x39e   : > { %v1175_v42 = vsub.f32 %v1102_v25, %v1165_v41 }
 0x3a0   : > { %v1179_v44 = vmul.f32 1.442695, %v1175_v42 }
 0x3a2   : > { %2740 = vpow2.f32 %v1179_v44 }
 0x3a4   : > { %v1174_v36 = vpop.xlane.xlu0 %1173 }
 0x3a5   : > { %v1178_v51 = vsub.f32 %v1159_v27, %v1174_v36 }
 0x3a7   : > { %v1171_v37 = vpop.xlane.xlu2 %1170  ;;  %v1185_v54 = vmul.f32 1.442695, %v1178_v51 }
 0x3a8   : > { %v3200_v45 = vpop.eup %2740  ;;  %v1177_v46 = vsub.f32 %v1140_v31, %v1171_v37 }
 0x3a9   : > { %v1187_v47 = vsel %vm1086_vm9, %v3200_v45, 0.0 }
 0x3aa   : > { %v1183_v48 = vmul.f32 1.442695, %v1177_v46  ;;  %1188 = vadd.xlane.f32.xlu1 %v1187_v47 }
 0x3ac   : > { %2742 = vpow2.f32 %v1183_v48  ;;  %v1168_v49 = vpop.xlane.xlu0 %1167 }
 0x3ad   : > { %v1176_v50 = vsub.f32 %v1121_v30, %v1168_v49 }
 0x3af   : > { %v1181_v52 = vmul.f32 1.442695, %v1176_v50  ;;  %v1506_v0 = vpop.permute.xlu2 %1505 }
 0x3b0   : > { %v1517_v4 = vshrl.u32 %v1506_v0, 16 }
 0x3b1   : > { %2744 = vpow2.f32 %v1181_v52 }
 0x3b2   : > { %v3204_v53 = vpop.eup %2742  ;;  %2746 = vpow2.f32 %v1185_v54 }
 0x3b3   : > { %v1193_v55 = vsel %vm1086_vm9, %v3204_v53, 0.0 }
 0x3b4   : > { %1194 = vadd.xlane.f32.xlu2 %v1193_v55 }
 0x3b5   : > { %v1500_v56 = vpop.permute.xlu1 %1499 }
 0x3b6   : > { %v1510_v59 = vshrl.u32 %v1500_v56, 16  ;;  %v1509_v62 = vpack.i.b16 %v1502_v43, %v1500_v56 }
 0x3b7   : > { %v3208_v57 = vpop.eup %2744 }
 0x3b8   : > { %v1190_v60 = vsel %vm1086_vm9, %v3208_v57, 0.0  ;;  %v1512_v1 = vpack.i.b16 %v1511_v61, %v1510_v59  ;;  %v3212_v2 = vpop.eup %2746  ;;  %v1523_v3 = vperm.slane %v1509_v62, %v3080_v5 }
 0x3b9   : > { %1191 = vadd.xlane.f32.xlu0 %v1190_v60  ;;  %v1196_v11 = vsel %vm1086_vm9, %v3212_v2, 0.0 }
 0x3ba   : > { %v1549_v7 = vperm.slane %v1512_v1, %v3080_v5  ;;  %v1531_v12 = vrot.slane %v1523_v3, 4 }
 0x3bc   : > { %v1557_v15 = vrot.slane %v1549_v7, 4 }
 0x3bf   : > { %v1504_v6 = vpop.permute.xlu0 %1503 }
 0x3c0   : > { %v1515_v8 = vpack.i.b16 %v1506_v0, %v1504_v6  ;;  %v1516_v9 = vshrl.u32 %v1504_v6, 16 }
 0x3c1   : > { %1197 = vadd.xlane.f32.xlu0 %v1196_v11 }
 0x3c2   : > { %v1518_v13 = vpack.i.b16 %v1517_v4, %v1516_v9  ;;  %v1528_v14 = vperm.slane %v1515_v8, %v3080_v5 }
 0x3c4   : > { %v1529_v16 = vrot.slane %v1528_v14, 4  ;;  %v1532_v17 = vsel %vm750_vm8, %v1528_v14, %v1531_v12  ;;  %v1554_v18 = vperm.slane %v1518_v13, %v3080_v5  ;;  %v1439_v14 = vshrl.u32 %v3076_v63, 16 }
 0x3c5   : > { %v1540_v19 = vperm.slane %v1532_v17, %v3086_v21 }
 0x3c6   : > { %v1530_v20 = vsel %vm750_vm8, %v1529_v16, %v1523_v3  ;;  %v1555_v22 = vrot.slane %v1554_v18, 4  ;;  %v1558_v23 = vsel %vm750_vm8, %v1554_v18, %v1557_v15  ;;  %v1438_v15 = vshrl.u32 %v3064_v58, 16 }
 0x3c7   : > { %v1536_v24 = vperm.slane %v1530_v20, %v3086_v21  ;;  %v1543_v25 = vrot.slane %v1540_v19, 4  ;;  %v1566_v26 = vperm.slane %v1558_v23, %v3086_v21  ;;  %v1445_v16 = vshrl.u32 %v3194_v40, 16 }
 0x3c8   : > { %v1556_v27 = vsel %vm750_vm8, %v1555_v22, %v1549_v7  ;;  %v1440_v17 = vpack.i.b16 %v1439_v14, %v1438_v15  ;;  %v1444_v18 = vshrl.u32 %v3190_v39, 16  ;;  %v1437_v19 = vpack.i.b16 %v3076_v63, %v3064_v58 }
 0x3c9   : > { %v1541_v28 = vrot.slane %v1536_v24, 4  ;;  %v1544_v29 = vsel %vm750_vm8, 0, %v1543_v25  ;;  %v1562_v30 = vperm.slane %v1556_v27, %v3086_v21  ;;  %v1569_v31 = vrot.slane %v1566_v26, 4 }
 0x3ca   : > { %v1698_v32 = vrot.slane %v1544_v29, 4  ;;  %v1693_v38 = vsel %vm750_vm8, %v1543_v25, %v1536_v24  ;;  %v1446_v20 = vpack.i.b16 %v1445_v16, %v1444_v18  ;;  %v1477_v22 = vperm.slane %v1440_v17, %v3080_v5 }
 0x3cb   : > { %v1542_v35 = vsel %vm750_vm8, 0, %v1541_v28  ;;  %v1567_v33 = vrot.slane %v1562_v30, 4  ;;  %v1570_v34 = vsel %vm750_vm8, 0, %v1569_v31  ;;  %v1712_v36 = vsel %vm750_vm8, %v1569_v31, %v1562_v30 }
 0x3cc   : > { %v1699_v41 = vsel %vm750_vm8, %v1698_v32, %v1542_v35  ;;  %v1717_v42 = vrot.slane %v1570_v34, 4  ;;  %v1697_v46 = vperm.slane %v1693_v38, %v3080_v5  ;;  %v1716_v50 = vperm.slane %v1712_v36, %v3080_v5 }
 0x3cd   : > { %v1568_v43 = vsel %vm750_vm8, 0, %v1567_v33  ;;  %v1703_v44 = vperm.slane %v1699_v41, %v3080_v5  ;;  %v1443_v23 = vpack.i.b16 %v3194_v40, %v3190_v39  ;;  %v1451_v24 = vperm.slane %v1437_v19, %v3080_v5 }
 0x3ce   : > { %v1718_v37 = vsel %vm750_vm8, %v1717_v42, %v1568_v43  ;;  %v1482_v25 = vperm.slane %v1446_v20, %v3080_v5  ;;  %v1485_v26 = vrot.slane %v1477_v22, 4 }
 0x3cf   : > { %v1704_v47 = vrot.slane %v1703_v44, 4  ;;  %v1722_v48 = vperm.slane %v1718_v37, %v3080_v5  ;;  %v1456_v27 = vperm.slane %v1443_v23, %v3080_v5  ;;  %v1459_v28 = vrot.slane %v1451_v24, 4 }
 0x3d0   : > { %v1483_v29 = vrot.slane %v1482_v25, 4  ;;  %v1486_v30 = vsel %vm750_vm8, %v1482_v25, %v1485_v26 }
 0x3d1   : > { %v1705_v49 = vsel %vm750_vm8, %v1704_v47, %v1697_v46  ;;  %v1723_v51 = vrot.slane %v1722_v48, 4  ;;  %v1457_v31 = vrot.slane %v1456_v27, 4  ;;  %v1494_v32 = vperm.slane %v1486_v30, %v3086_v21 }
 0x3d2   : > { %v1709_v52 = vperm.slane %v1705_v49, %v3086_v21  ;;  %v1484_v35 = vsel %vm750_vm8, %v1483_v29, %v1477_v22 }
 0x3d3   : > { %v1724_v54 = vsel %vm750_vm8, %v1723_v51, %v1716_v50  ;;  %v1458_v34 = vsel %vm750_vm8, %v1457_v31, %v1451_v24  ;;  %v1490_v38 = vperm.slane %v1484_v35, %v3086_v21  ;;  %v1497_v41 = vrot.slane %v1494_v32, 4 }
 0x3d4   : > { %v1728_v55 = vperm.slane %v1724_v54, %v3086_v21  ;;  %v1710_v56 = vrot.slane %v1709_v52, 4  ;;  %v1734_v59 = vshrl.u32 %v1709_v52, 16  ;;  %v1464_v42 = vperm.slane %v1458_v34, %v3086_v21 }
 0x3d5   : > { %1571 = vrot.lane.b32.xlu0 %v3064_v58, %s2878_s25  ;;  %v1460_v58 = vsel %vm750_vm8, %v1456_v27, %v1459_v28  ;;  %v1495_v36 = vrot.slane %v1490_v38, 4  ;;  %v1498_v37 = vsel %vm750_vm8, 0, %v1497_v41 }
 0x3d6   : > { %v1733_v60 = vpack.i.b16 %v1728_v55, %v1709_v52  ;;  %v1735_v61 = vshrl.u32 %v1728_v55, 16  ;;  %v1711_v62 = vsel %vm750_vm8, 0, %v1710_v56  ;;  %v1729_v0 = vrot.slane %v1728_v55, 4 }
 0x3d7   : > { %v1740_v7 = vshrl.u32 %v1711_v62, 16  ;;  %v1468_v33 = vperm.slane %v1460_v58, %v3086_v21  ;;  %v1469_v46 = vrot.slane %v1464_v42, 4  ;;  %v1667_v48 = vrot.slane %v1498_v37, 4 }
 0x3d8   : > { %v1797_v1 = vsel %vm1086_vm9, %v1733_v60, 0  ;;  %v1736_v3 = vpack.i.b16 %v1735_v61, %v1734_v59  ;;  %v1730_v4 = vsel %vm750_vm8, 0, %v1729_v0  ;;  %v1496_v49 = vsel %vm750_vm8, 0, %v1495_v36 }
 0x3d9   : > { %1806 = vmatpush.bf16.xpose.msra.mxu1 %v1797_v1  ;;  %v1739_v6 = vpack.i.b16 %v1730_v4, %v1711_v62  ;;  %v1741_v8 = vshrl.u32 %v1730_v4, 16  ;;  %v1471_v43 = vrot.slane %v1468_v33, 4  ;;  %v1470_v52 = vsel %vm750_vm8, 0, %v1469_v46 }
 0x3da   : > { %v1816_v9 = vsel %vm1086_vm9, %v1736_v3, 0  ;;  %v1668_v54 = vsel %vm750_vm8, %v1667_v48, %v1496_v49  ;;  %v1662_v0 = vsel %vm750_vm8, %v1497_v41, %v1490_v38 }
 0x3db   : > { %1825 = vmatpush.bf16.xpose.msra.mxu2 %v1816_v9  ;;  %v1835_v11 = vsel %vm1086_vm9, %v1739_v6, 0  ;;  %v1742_v12 = vpack.i.b16 %v1741_v8, %v1740_v7  ;;  %v1472_v47 = vsel %vm750_vm8, 0, %v1471_v43  ;;  %v1672_v61 = vperm.slane %v1668_v54, %v3080_v5 }
 0x3dc   : > { %1844 = vmatpush.bf16.xpose.msra.mxu3 %v1835_v11  ;;  %v1648_v50 = vrot.slane %v1472_v47, 4  ;;  %v1643_v4 = vsel %vm750_vm8, %v1471_v43, %v1464_v42 }
 0x3dd   : > { %v1854_v13 = vsel %vm1086_vm9, %v1742_v12, 0  ;;  %v1673_v3 = vrot.slane %v1672_v61, 4  ;;  %v1647_v9 = vperm.slane %v1643_v4, %v3080_v5 }
 0x3de   : > { %1863 = vmatpush.bf16.xpose.msrb.mxu0 %v1854_v13  ;;  %v1649_v56 = vsel %vm750_vm8, %v1648_v50, %v1470_v52 }
 0x3df   : > { %v1653_v62 = vperm.slane %v1649_v56, %v3080_v5 }
 0x3e1   : > { %v1654_v7 = vrot.slane %v1653_v62, 4 }
 0x3e3   : > { %v1655_v13 = vsel %vm750_vm8, %v1654_v7, %v1647_v9 }
 0x3e4   : > { %v1659_v18 = vperm.slane %v1655_v13, %v3086_v21 }
 0x3e6   : > { %v1660_v24 = vrot.slane %v1659_v18, 4  ;;  %v1684_v29 = vshrl.u32 %v1659_v18, 16 }
 0x41d   : > { %v1189_v44 = vpop.xlane.xlu1 %1188 }
 0x41e   : > { %2748 = vrcp.f32 %v1189_v44 }
 0x424   : > { %v2749_v51 = vpop.eup %2748 }
 0x425   : > { %v1203_v55 = vmul.f32 %v2749_v51, %v3200_v45  ;;  %v1666_v45 = vperm.slane %v1662_v0, %v3080_v5 }
 0x427   : > { %v1195_v59 = vpop.xlane.xlu2 %1194  ;;  %v1207_v60 = vpack.c.bf16 %v1203_v55, %v1203_v55  ;;  %v1674_v11 = vsel %vm750_vm8, %v1673_v3, %v1666_v45 }
 0x428   : > { %2750 = vrcp.f32 %v1195_v59  ;;  %v1678_v15 = vperm.slane %v1674_v11, %v3086_v21 }
 0x429   : > { %2597 = vmatmul.msk.bf16.vlgmr.msrb.gmra.mxu1 %vm1086_vm9, %v1207_v60 }
 0x42a   : > { %v1679_v20 = vrot.slane %v1678_v15, 4  ;;  %v1685_v28 = vshrl.u32 %v1678_v15, 16 }
 0x42c   : > { %v1192_v1 = vpop.xlane.xlu0 %1191  ;;  %v1680_v26 = vsel %vm750_vm8, 0, %v1679_v20  ;;  %v1686_v30 = vpack.i.b16 %v1685_v28, %v1684_v29 }
 0x42d   : > { %2752 = vrcp.f32 %v1192_v1  ;;  %v1691_v31 = vshrl.u32 %v1680_v26, 16 }
 0x42e   : > { %v2751_v6 = vpop.eup %2750 }
 0x42f   : > { %v1205_v8 = vmul.f32 %v2751_v6, %v3204_v53  ;;  %v1683_v53 = vpack.i.b16 %v1678_v15, %v1659_v18 }
 0x431   : > { %v1209_v12 = vpack.c.bf16 %v1205_v8, %v1205_v8 }
 0x433   : > { %v2753_v14 = vpop.eup %2752  ;;  %2599 = vmatmul.msk.bf16.vlgmr.msrb.gmra.mxu3 %vm1086_vm9, %v1209_v12 }
 0x434   : > { %v1204_v16 = vmul.f32 %v2753_v14, %v3208_v57  ;;  %v1198_v17 = vpop.xlane.xlu0 %1197  ;;  %v1661_v57 = vsel %vm750_vm8, 0, %v1660_v24 }
 0x435   : > { %2754 = vrcp.f32 %v1198_v17  ;;  %v1689_v27 = vpack.i.b16 %v1680_v26, %v1661_v57  ;;  %v1690_v58 = vshrl.u32 %v1661_v57, 16 }
 0x436   : > { %v1208_v19 = vpack.c.bf16 %v1204_v16, %v1204_v16 }
 0x437   : > { %v1692_v32 = vpack.i.b16 %v1691_v31, %v1690_v58 }
 0x438   : > { %2598 = vmatmul.msk.bf16.vlgmr.msrb.gmra.mxu2 %vm1086_vm9, %v1208_v19 }
 0x439   : > { %2601 = vmatmul.msk.bf16.vlgmr.msra.gmra.mxu1 %vm1086_vm9, %v1683_v53 }
 0x43b   : > { %v2755_v22 = vpop.eup %2754 }
 0x43c   : > { %v1206_v23 = vmul.f32 %v2755_v22, %v3212_v2 }
 0x43e   : > { %v1210_v25 = vpack.c.bf16 %v1206_v23, %v1206_v23 }
 0x440   : > { %2600 = vmatmul.msk.bf16.vlgmr.msra.gmra.mxu0 %vm1086_vm9, %v1210_v25 }
 0x443   : > { %2603 = vmatmul.msk.bf16.vlgmr.msra.gmra.mxu3 %vm1086_vm9, %v1689_v27 }
 0x448   : > { %2602 = vmatmul.msk.bf16.vlgmr.msra.gmra.mxu2 %vm1086_vm9, %v1686_v30 }
 0x450   : > { %2604 = vmatmul.msk.bf16.vlgmr.msrb.gmra.mxu0 %vm1086_vm9, %v1692_v32 }
 0x4a6   : > { %v1227_v2 = vpop.f32.mrf.mxu1 }
 0x4a7   : > { %v1288_v41 = vpack.c.bf16 %v1227_v2, %v1227_v2 }
 0x4a9   : > { %v1295_v37 = vshrl.u32 %v1288_v41, 16 }
 0x4ae   : > { %v1229_v35 = vpop.f32.mrf.mxu1 }
 0x4b6   : > { %v1265_v33 = vpop.f32.mrf.mxu3  ;;  %v3302_v34 = vpop.f32.mrf.mxu1 }
 0x4b7   : > { %v1869_v38 = vsel %vm1086_vm9, %v3302_v34, -inf  ;;  %v1290_v42 = vpack.c.bf16 %v1265_v33, %v1265_v33 }
 0x4b8   : > { %1870 = vmax.xlane.f32.xlu1 %v1869_v38 }
 0x4b9   : > { %v1301_v51 = vshrl.u32 %v1290_v42, 16 }
 0x4bb   : > { %v1246_v43 = vpop.f32.mrf.mxu2 }
 0x4bc   : > { %v1289_v44 = vpack.c.bf16 %v1246_v43, %v1246_v43 }
 0x4bd   : > { %v1284_v36 = vpop.f32.mrf.mxu0 }
 0x4be   : > { %v1294_v46 = vpack.i.b16 %v1289_v44, %v1288_v41  ;;  %v1296_v47 = vshrl.u32 %v1289_v44, 16  ;;  %v1291_v48 = vpack.c.bf16 %v1284_v36, %v1284_v36  ;;  %v1267_v49 = vpop.f32.mrf.mxu3  ;;  %v1810_v50 = vpop.f32.mrf.mxu1 }
 0x4c0   : > { %v1297_v52 = vpack.i.b16 %v1296_v47, %v1295_v37  ;;  %v1308_v54 = vperm.slane %v1294_v46, %v3080_v5  ;;  %v1300_v55 = vpack.i.b16 %v1291_v48, %v1290_v42  ;;  %v1302_v56 = vshrl.u32 %v1291_v48, 16 }
 0x4c2   : > { %v1316_v59 = vrot.slane %v1308_v54, 4  ;;  %v1334_v60 = vperm.slane %v1297_v52, %v3080_v5  ;;  %v1303_v61 = vpack.i.b16 %v1302_v56, %v1301_v51  ;;  %v1313_v62 = vperm.slane %v1300_v55, %v3080_v5 }
 0x4c3   : > { %v1248_v0 = vpop.f32.mrf.mxu2 }
 0x4c4   : > { %v1342_v1 = vrot.slane %v1334_v60, 4  ;;  %v1314_v3 = vrot.slane %v1313_v62, 4  ;;  %v1317_v4 = vsel %vm750_vm8, %v1313_v62, %v1316_v59  ;;  %v1339_v6 = vperm.slane %v1303_v61, %v3080_v5 }
 0x4c5   : > { %v1325_v45 = vperm.slane %v1317_v4, %v3086_v21  ;;  %v1286_v7 = vpop.f32.mrf.mxu0 }
 0x4c6   : > { %v1315_v8 = vsel %vm750_vm8, %v1314_v3, %v1308_v54  ;;  %v1340_v9 = vrot.slane %v1339_v6, 4  ;;  %v1343_v11 = vsel %vm750_vm8, %v1339_v6, %v1342_v1  ;;  %v3314_v12 = vpop.f32.mrf.mxu3  ;;  %v1572_v6 = vpop.permute.xlu0 %1571 }
 0x4c7   : > { %v1321_v13 = vperm.slane %v1315_v8, %v3086_v21  ;;  %v1328_v14 = vrot.slane %v1325_v45, 4  ;;  %v1351_v15 = vperm.slane %v1343_v11, %v3086_v21  ;;  %v1875_v16 = vsel %vm1086_vm9, %v3314_v12, -inf }
 0x4c8   : > { %v1341_v17 = vsel %vm750_vm8, %v1340_v9, %v1334_v60  ;;  %1876 = vmax.xlane.f32.xlu0 %v1875_v16 }
 0x4c9   : > { %v1326_v18 = vrot.slane %v1321_v13, 4  ;;  %v1329_v19 = vsel %vm750_vm8, 0, %v1328_v14  ;;  %v1347_v53 = vperm.slane %v1341_v17, %v3086_v21  ;;  %v1354_v20 = vrot.slane %v1351_v15, 4 }
 0x4ca   : > { %v1356_v22 = vsel %vm750_vm8, %v1328_v14, %v1321_v13  ;;  %v1361_v23 = vrot.slane %v1329_v19, 4  ;;  %v1582_v17 = vshrl.u32 %v1572_v6, 16 }
 0x4cb   : > { %v1327_v24 = vsel %vm750_vm8, 0, %v1326_v18  ;;  %v1352_v25 = vrot.slane %v1347_v53, 4  ;;  %v1355_v26 = vsel %vm750_vm8, 0, %v1354_v20  ;;  %v1827_v57 = vpop.f32.mrf.mxu2  ;;  %v1375_v28 = vsel %vm750_vm8, %v1354_v20, %v1347_v53 }
 0x4cc   : > { %v1362_v27 = vsel %vm750_vm8, %v1361_v23, %v1327_v24  ;;  %v1380_v29 = vrot.slane %v1355_v26, 4  ;;  %v1360_v33 = vperm.slane %v1356_v22, %v3080_v5  ;;  %v1379_v43 = vperm.slane %v1375_v28, %v3080_v5 }
 0x4cd   : > { %v1353_v30 = vsel %vm750_vm8, 0, %v1352_v25  ;;  %v1865_v31 = vpop.f32.mrf.mxu0  ;;  %v1366_v58 = vperm.slane %v1362_v27, %v3080_v5  ;;  %v1872_v50 = vsel %vm1086_vm9, %v1827_v57, -inf }
 0x4ce   : > { %v1878_v32 = vsel %vm1086_vm9, %v1865_v31, -inf  ;;  %v1848_v2 = vpop.f32.mrf.mxu3  ;;  %v1381_v35 = vsel %vm750_vm8, %v1380_v29, %v1353_v30 }
 0x4cf   : > { %1879 = vmax.xlane.f32.xlu2 %v1878_v32  ;;  %v1367_v38 = vrot.slane %v1366_v58, 4  ;;  %v1385_v41 = vperm.slane %v1381_v35, %v3080_v5 }
 0x4d1   : > { %1573 = vrot.lane.b32.xlu1 %v3076_v63, %s2878_s25  ;;  %v1368_v42 = vsel %vm750_vm8, %v1367_v38, %v1360_v33  ;;  %v1386_v44 = vrot.slane %v1385_v41, 4 }
 0x4d2   : > { %v3339_v36 = vperm.slane %v1368_v42, %v3086_v21 }
 0x4d3   : > { %v1829_v37 = vpop.f32.mrf.mxu2  ;;  %v1387_v46 = vsel %vm750_vm8, %v1386_v44, %v1379_v43 }
 0x4d4   : > { %v3343_v47 = vperm.slane %v1387_v46, %v3086_v21  ;;  %v1373_v48 = vrot.slane %v3339_v36, 4  ;;  %v1397_v63 = vshrl.u32 %v3339_v36, 16 }
 0x4d5   : > { %v1867_v49 = vpop.f32.mrf.mxu0 }
 0x4d6   : > { %v1398_v51 = vshrl.u32 %v3343_v47, 16  ;;  %v1396_v52 = vpack.i.b16 %v3343_v47, %v3339_v36  ;;  %v3352_v54 = vsel %vm750_vm8, 0, %v1373_v48  ;;  %v1392_v55 = vrot.slane %v3343_v47, 4 }
 0x4d7   : > { %1873 = vmax.xlane.f32.xlu2 %v1872_v50  ;;  %v1403_v61 = vshrl.u32 %v3352_v54, 16 }
 0x4d8   : > { %v3355_v56 = vpack.i.b16 %v1398_v51, %v1397_v63  ;;  %v3358_v59 = vsel %vm750_vm8, 0, %v1392_v55 }
 0x4d9   : > { %v1402_v60 = vpack.i.b16 %v3358_v59, %v3352_v54  ;;  %v1404_v62 = vshrl.u32 %v3358_v59, 16 }
 0x4db   : > { %v3364_v0 = vpack.i.b16 %v1404_v62, %v1403_v61 }
 0x4dc   : > { %1577 = vrot.lane.b32.xlu0 %v3194_v40, %s2878_s25 }
 0x4ef   : > { %1575 = vrot.lane.b32.xlu2 %v3190_v39, %s2878_s25  ;;  %s2405_s25 = sshll.u32 %s2885_s28, 4  ;;  %s2406_s25 = int_to_ptr.vmem [resolvable:$true] %s2405_s25 }
 0x52b   : > { %v1871_v1 = vpop.xlane.xlu1 %1870 }
 0x52c   : > { %v1881_v3 = vsub.f32 %v3302_v34, %v1871_v1 }
 0x52e   : > { %v1885_v4 = vmul.f32 1.442695, %v1881_v3 }
 0x530   : > { %2756 = vpow2.f32 %v1885_v4 }
 0x536   : > { %v3371_v45 = vpop.eup %2756 }
 0x537   : > { %v1893_v7 = vsel %vm1086_vm9, %v3371_v45, 0.0 }
 0x538   : > { %1894 = vadd.xlane.f32.xlu2 %v1893_v7 }
 0x53b   : > { %v1877_v8 = vpop.xlane.xlu0 %1876 }
 0x53c   : > { %v1883_v9 = vsub.f32 %v3314_v12, %v1877_v8 }
 0x53e   : > { %v1889_v11 = vmul.f32 1.442695, %v1883_v9 }
 0x540   : > { %2758 = vpow2.f32 %v1889_v11 }
 0x542   : > { %v1880_v40 = vpop.xlane.xlu2 %1879 }
 0x543   : > { %v1574_v34 = vpop.permute.xlu1 %1573  ;;  %v1884_v18 = vsub.f32 %v1865_v31, %v1880_v40 }
 0x544   : > { %v1583_v15 = vshrl.u32 %v1574_v34, 16  ;;  %v1581_v19 = vpack.i.b16 %v1574_v34, %v1572_v6 }
 0x545   : > { %v1891_v22 = vmul.f32 1.442695, %v1884_v18 }
 0x546   : > { %v3376_v13 = vpop.eup %2758  ;;  %v1584_v20 = vpack.i.b16 %v1583_v15, %v1582_v17  ;;  %v1595_v23 = vperm.slane %v1581_v19, %v3080_v5 }
 0x547   : > { %v1899_v39 = vsel %vm1086_vm9, %v3376_v13, 0.0 }
 0x548   : > { %1900 = vadd.xlane.f32.xlu0 %v1899_v39  ;;  %v1621_v25 = vperm.slane %v1584_v20, %v3080_v5 }
 0x54a   : > { %v1874_v14 = vpop.xlane.xlu2 %1873  ;;  %v1629_v32 = vrot.slane %v1621_v25, 4 }
 0x54b   : > { %v1882_v16 = vsub.f32 %v1827_v57, %v1874_v14  ;;  %v1603_v57 = vrot.slane %v1595_v23, 4 }
 0x54d   : > { %v1887_v53 = vmul.f32 1.442695, %v1882_v16 }
 0x54e   : > { %v1578_v12 = vpop.permute.xlu0 %1577 }
 0x54f   : > { %2760 = vpow2.f32 %v1887_v53  ;;  %v1589_v26 = vshrl.u32 %v1578_v12, 16 }
 0x550   : > { %2762 = vpow2.f32 %v1891_v22 }
 0x552   : > { %v1576_v24 = vpop.permute.xlu2 %1575 }
 0x553   : > { %v1587_v27 = vpack.i.b16 %v1578_v12, %v1576_v24  ;;  %v1588_v28 = vshrl.u32 %v1576_v24, 16 }
 0x555   : > { %v3382_v29 = vpop.eup %2760  ;;  %v1590_v30 = vpack.i.b16 %v1589_v26, %v1588_v28  ;;  %v1600_v31 = vperm.slane %v1587_v27, %v3080_v5 }
 0x556   : > { %v1896_v58 = vsel %vm1086_vm9, %v3382_v29, 0.0  ;;  %v3394_v48 = vpop.eup %2762 }
 0x557   : > { %v1601_v2 = vrot.slane %v1600_v31, 4  ;;  %v1604_v35 = vsel %vm750_vm8, %v1600_v31, %v1603_v57  ;;  %v1626_v33 = vperm.slane %v1590_v30, %v3080_v5  ;;  %1897 = vadd.xlane.f32.xlu1 %v1896_v58  ;;  %v1902_v4 = vsel %vm1086_vm9, %v3394_v48, 0.0 }
 0x558   : > { %v1612_v38 = vperm.slane %v1604_v35, %v3086_v21 }
 0x559   : > { %v1602_v41 = vsel %vm750_vm8, %v1601_v2, %v1595_v23  ;;  %v1627_v42 = vrot.slane %v1626_v33, 4  ;;  %v1630_v43 = vsel %vm750_vm8, %v1626_v33, %v1629_v32 }
 0x55a   : > { %v1608_v44 = vperm.slane %v1602_v41, %v3086_v21  ;;  %v1615_v37 = vrot.slane %v1612_v38, 4  ;;  %v1638_v46 = vperm.slane %v1630_v43, %v3086_v21  ;;  %v1406_v38 = vunpack.c.l.b16 %v3355_v56 }
 0x55b   : > { %v1628_v49 = vsel %vm750_vm8, %v1627_v42, %v1621_v25 }
 0x55c   : > { %v1613_v50 = vrot.slane %v1608_v44, 4  ;;  %v1616_v63 = vsel %vm750_vm8, 0, %v1615_v37  ;;  %v1634_v51 = vperm.slane %v1628_v49, %v3086_v21  ;;  %v1641_v55 = vrot.slane %v1638_v46, 4 }
 0x55d   : > { %v1748_v61 = vrot.slane %v1616_v63, 4  ;;  %v1743_v6 = vsel %vm750_vm8, %v1615_v37, %v1608_v44  ;;  %v1407_v41 = vpack.c.b16 %v1406_v38, %v1406_v38 }
 0x55e   : > { %v1614_v62 = vsel %vm750_vm8, 0, %v1613_v50  ;;  %v1639_v1 = vrot.slane %v1634_v51, 4  ;;  %v1642_v3 = vsel %vm750_vm8, 0, %v1641_v55  ;;  %v1762_v40 = vsel %vm750_vm8, %v1641_v55, %v1634_v51 }
 0x55f   : > { %v1749_v7 = vsel %vm750_vm8, %v1748_v61, %v1614_v62  ;;  %v1767_v8 = vrot.slane %v1642_v3, 4  ;;  %1903 = vadd.xlane.f32.xlu1 %v1902_v4  ;;  %v1747_v34 = vperm.slane %v1743_v6, %v3080_v5  ;;  %v1766_v17 = vperm.slane %v1762_v40, %v3080_v5 }
 0x560   : > { %v1640_v9 = vsel %vm750_vm8, 0, %v1639_v1  ;;  %v1753_v11 = vperm.slane %v1749_v7, %v3080_v5 }
 0x561   : > { %v1768_v39 = vsel %vm750_vm8, %v1767_v8, %v1640_v9 }
 0x562   : > { %v1754_v14 = vrot.slane %v1753_v11, 4  ;;  %v1772_v15 = vperm.slane %v1768_v39, %v3080_v5 }
 0x564   : > { %v1755_v16 = vsel %vm750_vm8, %v1754_v14, %v1747_v34  ;;  %v1773_v18 = vrot.slane %v1772_v15, 4 }
 0x565   : > { %v1759_v19 = vperm.slane %v1755_v16, %v3086_v21 }
 0x566   : > { %v1774_v53 = vsel %vm750_vm8, %v1773_v18, %v1766_v17 }
 0x567   : > { %v1778_v20 = vperm.slane %v1774_v53, %v3086_v21  ;;  %v1760_v12 = vrot.slane %v1759_v19, 4  ;;  %v1784_v22 = vshrl.u32 %v1759_v19, 16 }
 0x569   : > { %v1783_v23 = vpack.i.b16 %v1778_v20, %v1759_v19  ;;  %v1785_v24 = vshrl.u32 %v1778_v20, 16  ;;  %v1761_v25 = vsel %vm750_vm8, 0, %v1760_v12  ;;  %v1779_v26 = vrot.slane %v1778_v20, 4 }
 0x56a   : > { %v1790_v31 = vshrl.u32 %v1761_v25, 16 }
 0x56b   : > { %v1921_v27 = vsel %vm1214_vm10, %v1783_v23, 0  ;;  %v1786_v28 = vpack.i.b16 %v1785_v24, %v1784_v22  ;;  %v1780_v57 = vsel %vm750_vm8, 0, %v1779_v26 }
 0x56c   : > { %1930 = vmatpush.bf16.msrb.mxu1 %v1921_v27  ;;  %v1789_v30 = vpack.i.b16 %v1780_v57, %v1761_v25  ;;  %v1791_v58 = vshrl.u32 %v1780_v57, 16 }
 0x56d   : > { %v1940_v32 = vsel %vm1214_vm10, %v1786_v28, 0 }
 0x56e   : > { %1949 = vmatpush.bf16.msrb.mxu2 %v1940_v32  ;;  %v1959_v2 = vsel %vm1214_vm10, %v1789_v30, 0  ;;  %v1792_v35 = vpack.i.b16 %v1791_v58, %v1790_v31 }
 0x56f   : > { %1968 = vmatpush.bf16.msrb.mxu3 %v1959_v2 }
 0x570   : > { %v1978_v33 = vsel %vm1214_vm10, %v1792_v35, 0 }
 0x571   : > { %1987 = vmatpush.bf16.msra.mxu0 %v1978_v33 }
 0x578   : > { %1408 = vrot.lane.b32.xlu1 %v1407_v41, %s2881_s26 }
 0x5ab   : > { %v1895_v42 = vpop.xlane.xlu2 %1894 }
 0x5ac   : > { %2764 = vrcp.f32 %v1895_v42 }
 0x5b2   : > { %v2765_v43 = vpop.eup %2764 }
 0x5b3   : > { %v1909_v44 = vmul.f32 %v2765_v43, %v3371_v45 }
 0x5b5   : > { %v1913_v37 = vpack.c.bf16 %v1909_v44, %v1909_v44 }
 0x5b7   : > { %2605 = vmatmul.msk.bf16.vlgmr.msrb.gmra.mxu1 %vm1086_vm9, %v1913_v37 }
 0x5bb   : > { %v1901_v46 = vpop.xlane.xlu0 %1900 }
 0x5bc   : > { %2766 = vrcp.f32 %v1901_v46 }
 0x5c2   : > { %v2767_v49 = vpop.eup %2766 }
 0x5c3   : > { %v1911_v50 = vmul.f32 %v2767_v49, %v3376_v13 }
 0x5c5   : > { %v1915_v63 = vpack.c.bf16 %v1911_v50, %v1911_v50 }
 0x5c7   : > { %2607 = vmatmul.msk.bf16.vlgmr.msrb.gmra.mxu3 %vm1086_vm9, %v1915_v63 }
 0x5ca   : > { %v1898_v56 = vpop.xlane.xlu1 %1897 }
 0x5cb   : > { %2768 = vrcp.f32 %v1898_v56 }
 0x5d1   : > { %v2769_v51 = vpop.eup %2768 }
 0x5d2   : > { %v1910_v55 = vmul.f32 %v2769_v51, %v3382_v29  ;;  %v1904_v61 = vpop.xlane.xlu1 %1903 }
 0x5d3   : > { %2770 = vrcp.f32 %v1904_v61 }
 0x5d4   : > { %v1914_v62 = vpack.c.bf16 %v1910_v55, %v1910_v55 }
 0x5d6   : > { %2606 = vmatmul.msk.bf16.vlgmr.msrb.gmra.mxu2 %vm1086_vm9, %v1914_v62 }
 0x5d9   : > { %v2771_v45 = vpop.eup %2770 }
 0x5da   : > { %v1912_v1 = vmul.f32 %v2771_v45, %v3394_v48 }
 0x5dc   : > { %v1916_v3 = vpack.c.bf16 %v1912_v1, %v1912_v1 }
 0x5de   : > { %2608 = vmatmul.msk.bf16.vlgmr.msra.gmra.mxu0 %vm1086_vm9, %v1916_v3 }
 0x5ea   : > { %v1409_v59 = vpop.permute.xlu1 %1408 }
 0x634   : > { %v1932_v13 = vpop.f32.mrf.mxu1 }
 0x635   : > { %v1993_v8 = vpack.c.bf16 %v1932_v13, %v1932_v13 }
 0x637   : > { %v2000_v39 = vshrl.u32 %v1993_v8, 16 }
 0x63c   : > { %v1934_v4 = vpop.f32.mrf.mxu1 }
 0x64a   : > { %v1970_v6 = vpop.f32.mrf.mxu3 }
 0x64b   : > { %v1995_v9 = vpack.c.bf16 %v1970_v6, %v1970_v6 }
 0x64d   : > { %v2006_v16 = vshrl.u32 %v1995_v9, 16 }
 0x652   : > { %v1972_v7 = vpop.f32.mrf.mxu3 }
 0x659   : > { %v1951_v11 = vpop.f32.mrf.mxu2 }
 0x65a   : > { %v1994_v40 = vpack.c.bf16 %v1951_v11, %v1951_v11 }
 0x65b   : > { %v1989_v29 = vpop.f32.mrf.mxu0 }
 0x65c   : > { %v1999_v34 = vpack.i.b16 %v1994_v40, %v1993_v8  ;;  %v2001_v14 = vshrl.u32 %v1994_v40, 16  ;;  %v1996_v15 = vpack.c.bf16 %v1989_v29, %v1989_v29 }
 0x65e   : > { %v2002_v17 = vpack.i.b16 %v2001_v14, %v2000_v39  ;;  %v2013_v48 = vperm.slane %v1999_v34, %v3080_v5  ;;  %v2005_v18 = vpack.i.b16 %v1996_v15, %v1995_v9  ;;  %v2007_v19 = vshrl.u32 %v1996_v15, 16 }
 0x660   : > { %v2021_v53 = vrot.slane %v2013_v48, 4  ;;  %v2039_v20 = vperm.slane %v2002_v17, %v3080_v5  ;;  %v2008_v12 = vpack.i.b16 %v2007_v19, %v2006_v16  ;;  %v2018_v22 = vperm.slane %v2005_v18, %v3080_v5 }
 0x661   : > { %v1953_v23 = vpop.f32.mrf.mxu2 }
 0x662   : > { %v2047_v24 = vrot.slane %v2039_v20, 4  ;;  %v2019_v25 = vrot.slane %v2018_v22, 4  ;;  %v2022_v26 = vsel %vm750_vm8, %v2018_v22, %v2021_v53  ;;  %v2044_v27 = vperm.slane %v2008_v12, %v3080_v5 }
 0x663   : > { %v2030_v28 = vperm.slane %v2022_v26, %v3086_v21  ;;  %v1991_v57 = vpop.f32.mrf.mxu0  ;;  %v1410_v22 = vunpack.c.l.b16 %v1402_v60 }
 0x664   : > { %v2020_v30 = vsel %vm750_vm8, %v2019_v25, %v2013_v48  ;;  %v2045_v31 = vrot.slane %v2044_v27, 4  ;;  %v2048_v58 = vsel %vm750_vm8, %v2044_v27, %v2047_v24  ;;  %v1414_v25 = vunpack.c.l.b16 %v3364_v0  ;;  %v2670_v27 = vld [vmem:[%s3576_s15 + $0x8] sm:$0xff] }
 0x665   : > { %v2026_v32 = vperm.slane %v2020_v30, %v3086_v21  ;;  %v2033_v2 = vrot.slane %v2030_v28, 4  ;;  %v2056_v35 = vperm.slane %v2048_v58, %v3086_v21  ;;  %v1411_v24 = vpack.c.b16 %v1410_v22, %v1410_v22  ;;  %2162 = vmatpush.bf16.msra.mxu1 %v2670_v27  ;;  %v2669_v28 = vld [vmem:[%s3576_s15] sm:$0xff] }
 0x666   : > { %v2046_v33 = vsel %vm750_vm8, %v2045_v31, %v2039_v20  ;;  %v1415_v26 = vpack.c.b16 %v1414_v25, %v1414_v25  ;;  %v1420_v0 = vsel %vm1086_vm9, %v1396_v52, %v1409_v59  ;;  %v2679_v59 = vld [vmem:[%s3026_s17 + $0x30] sm:$0xff] }
 0x667   : > { %v2031_v38 = vrot.slane %v2026_v32, 4  ;;  %v2034_v41 = vsel %vm750_vm8, 0, %v2033_v2  ;;  %v2052_v42 = vperm.slane %v2046_v33, %v3086_v21  ;;  %v2059_v43 = vrot.slane %v2056_v35, 4 }
 0x668   : > { %v2066_v44 = vrot.slane %v2034_v41, 4  ;;  %v2061_v50 = vsel %vm750_vm8, %v2033_v2, %v2026_v32 }
 0x669   : > { %v2032_v37 = vsel %vm750_vm8, 0, %v2031_v38  ;;  %v2057_v46 = vrot.slane %v2052_v42, 4  ;;  %v2060_v49 = vsel %vm750_vm8, 0, %v2059_v43  ;;  %v2080_v61 = vsel %vm750_vm8, %v2059_v43, %v2052_v42  ;;  %2163 = vmatpush.bf16.msra.mxu1 %v2669_v28  ;;  %v2729_v42 = vld [vmem:[%s3577_s18] ss:$0 sm:$0xff] }
 0x66a   : > { %v2067_v63 = vsel %vm750_vm8, %v2066_v44, %v2032_v37  ;;  %v2085_v56 = vrot.slane %v2060_v49, 4  ;;  %v2065_v45 = vperm.slane %v2061_v50, %v3080_v5  ;;  %v2084_v4 = vperm.slane %v2080_v61, %v3080_v5  ;;  %v2788_v37 = vld [vmem:[#allocation2] sm:$0xff]  ;;  %v2789_v49 = vld [vmem:[#allocation2 + $0x8] sm:$0xff] }
 0x66b   : > { %v2058_v51 = vsel %vm750_vm8, 0, %v2057_v46  ;;  %v2071_v55 = vperm.slane %v2067_v63, %v3080_v5 }
 0x66c   : > { %v2086_v62 = vsel %vm750_vm8, %v2085_v56, %v2058_v51 }
 0x66d   : > { %v2072_v1 = vrot.slane %v2071_v55, 4  ;;  %v2090_v3 = vperm.slane %v2086_v62, %v3080_v5 }
 0x66f   : > { %v2073_v13 = vsel %vm750_vm8, %v2072_v1, %v2065_v45  ;;  %v2091_v6 = vrot.slane %v2090_v3, 4 }
 0x670   : > { %v2077_v7 = vperm.slane %v2073_v13, %v3086_v21 }
 0x671   : > { %v2092_v8 = vsel %vm750_vm8, %v2091_v6, %v2084_v4  ;;  %v2672_v6 = vld [vmem:[%s3016_s3 + $0x8] sm:$0xff] }
 0x672   : > { %v2096_v9 = vperm.slane %v2092_v8, %v3086_v21  ;;  %v2078_v11 = vrot.slane %v2077_v7, 4  ;;  %v2102_v40 = vshrl.u32 %v2077_v7, 16  ;;  %2258 = vmatpush.bf16.msra.mxu2 %v2672_v6 }
 0x674   : > { %v2103_v29 = vshrl.u32 %v2096_v9, 16  ;;  %v2097_v39 = vrot.slane %v2096_v9, 4  ;;  %v2101_v34 = vpack.i.b16 %v2096_v9, %v2077_v7  ;;  %v2079_v14 = vsel %vm750_vm8, 0, %v2078_v11  ;;  %v2671_v11 = vld [vmem:[%s3016_s3] sm:$0xff] }
 0x675   : > { %v2108_v18 = vshrl.u32 %v2079_v14, 16 }
 0x676   : > { %v2104_v15 = vpack.i.b16 %v2103_v29, %v2102_v40  ;;  %v2098_v16 = vsel %vm750_vm8, 0, %v2097_v39  ;;  %2259 = vmatpush.bf16.msra.mxu2 %v2671_v11 }
 0x677   : > { %v2107_v17 = vpack.i.b16 %v2098_v16, %v2079_v14  ;;  %v2109_v48 = vshrl.u32 %v2098_v16, 16 }
 0x678   : > { %v2111_v5 = vunpack.c.l.b16 %v2104_v15 }
 0x679   : > { %v2115_v19 = vunpack.c.l.b16 %v2107_v17  ;;  %v2110_v20 = vpack.i.b16 %v2109_v48, %v2108_v18 }
 0x67a   : > { %v2112_v53 = vpack.c.b16 %v2111_v5, %v2111_v5 }
 0x67b   : > { %v2116_v12 = vpack.c.b16 %v2115_v19, %v2115_v19  ;;  %v2119_v21 = vunpack.c.l.b16 %v2110_v20 }
 0x67c   : > { %2113 = vrot.lane.b32.xlu0 %v2112_v53, %s2881_s26 }
 0x67d   : > { %2117 = vrot.lane.b32.xlu2 %v2116_v12, %s2882_s29  ;;  %v2120_v23 = vpack.c.b16 %v2119_v21, %v2119_v21 }
 0x684   : > { %2121 = vrot.lane.b32.xlu0 %v2120_v23, %s2883_s13 }
 0x685   : > { %1412 = vrot.lane.b32.xlu2 %v1411_v24, %s2882_s29  ;;  %v2731_v24 = vld [vmem:[%s573_s23] ss:$0 sm:$0xff] }
 0x68c   : > { %1416 = vrot.lane.b32.xlu0 %v1415_v26, %s2883_s13  ;;  %s3579_s13 = sld [smem:[#allocation17_spill]] }
 0x692   : > { %s2407_s16 = sshll.u32 %s3579_s13, 4  ;;  %s2408_s16 = int_to_ptr.hbm [resolvable:$true] %s2407_s16 }
 0x6d7   : > { %v2118_v30 = vpop.permute.xlu2 %2117 }
 0x6df   : > { %v1413_v58 = vpop.permute.xlu2 %1412 }
 0x6e0   : > { %v1423_v2 = vsel %vm1421_vm12, %v1420_v0, %v1413_v58  ;;  %v2678_v0 = vld [vmem:[%s3026_s17 + $0x28] sm:$0xff] }
 0x6ee   : > { %v2114_v57 = vpop.permute.xlu0 %2113 }
 0x6ef   : > { %v2125_v54 = vsel %vm1086_vm9, %v2101_v34, %v2114_v57 }
 0x6f0   : > { %v2127_v60 = vsel %vm1421_vm12, %v2125_v54, %v2118_v30  ;;  %v2732_v54 = vld [vmem:[%s581_s5] ss:$0 sm:$0xff]  ;;  %s3578_s5 = sld [smem:[#allocation12_spill]] }
 0x6f6   : > { %v2122_v31 = vpop.permute.xlu0 %2121  ;;  %s3580_s19 = sadd.s32 4294967295, %s3578_s5  }
 0x6f7   : > { %v2129_v32 = vsel %vm1424_vm11, %v2127_v60, %v2122_v31  ;;  %v2680_v31 = vld [vmem:[%s3026_s17 + $0x38] sm:$0xff]  ;;  %p2685_p6 = scmp.eq.s32.totalorder %s3580_s19, 1 }
 0x6f8   : > { %v2131_v35 = vrot.slane %v2129_v32, 4  ;;  %2379 = vmatpush.bf16.msra.mxu3 %v2680_v31 }
 0x6fc   : > { %2380 = vmatpush.bf16.msra.mxu3 %v2679_v59 }
 0x6fe   : > { %v1417_v33 = vpop.permute.xlu0 %1416 }
 0x6ff   : > { %v1426_v38 = vsel %vm1424_vm11, %v1423_v2, %v1417_v33  ;;  %v2677_v33 = vld [vmem:[%s3026_s17 + $0x20] sm:$0xff] }
 0x700   : > { %v2133_v41 = vsel %vm1214_vm10, %v1426_v38, %v2131_v35  ;;  %2381 = vmatpush.bf16.msra.mxu3 %v2678_v0 }
 0x701   : > { %2617 = vmatmul.msk.bf16.vlgmr.msra.gmra.mxu1 %vm619_vm0, %v2133_v41 }
 0x704   : > { %2382 = vmatpush.bf16.msra.mxu3 %v2677_v33 }
 0x77e   : > { %v2165_v43 = vpop.f32.mrf.mxu1 }
 0x77f   : > { %v2166_v44 = vadd.f32 %v2729_v42, %v2165_v43 }
 0x781   : > { %v3481_v46 = vadd.f32 %v2788_v37, %v2166_v44  ;;  %v2676_v37 = vld [vmem:[%s3026_s17 + $0x18] sm:$0xff] }
 0x782   : > { %2383 = vmatpush.bf16.msra.mxu3 %v2676_v37 }
 0x783   : > { %v2174_v36 = vsel %vm619_vm0, %v3481_v46, 0.0 }
 0x784   : > { %2175 = vadd.xlane.f32.xlu1 %v2174_v36 }
 0x786   : > { %v2167_v47 = vpop.f32.mrf.mxu1 }
 0x787   : > { %v2168_v52 = vadd.f32 %v2729_v42, %v2167_v47 }
 0x789   : > { %v3485_v50 = vadd.f32 %v2789_v49, %v2168_v52 }
 0x78b   : > { %v2177_v63 = vsel %vm619_vm0, %v3485_v50, 0.0 }
 0x78c   : > { %2178 = vadd.xlane.f32.xlu2 %v2177_v63  ;;  %v2675_v63 = vld [vmem:[%s3026_s17 + $0x10] sm:$0xff] }
 0x78d   : > { %2384 = vmatpush.bf16.msra.mxu3 %v2675_v63 }
 0x7f7   : > { %v2176_v56 = vpop.xlane.xlu1 %2175 }
 0x7f8   : > { %v2180_v51 = vmul.f32 %v2176_v56, %v3037_v10 }
 0x7fa   : > { %v2182_v55 = vsub.f32 %v3481_v46, %v2180_v51 }
 0x7fc   : > { %v2184_v61 = vmul.f32 %v2182_v55, %v2182_v55 }
 0x7fe   : > { %v2186_v62 = vsel %vm619_vm0, %v2184_v61, 0.0 }
 0x7ff   : > { %v2179_v45 = vpop.xlane.xlu2 %2178  ;;  %2187 = vadd.xlane.f32.xlu0 %v2186_v62 }
 0x800   : > { %v2181_v1 = vmul.f32 %v2179_v45, %v3037_v10 }
 0x802   : > { %v2183_v3 = vsub.f32 %v3485_v50, %v2181_v1  ;;  %v2673_v1 = vld [vmem:[%s3026_s17] sm:$0xff] }
 0x804   : > { %v2185_v13 = vmul.f32 %v2183_v3, %v2183_v3 }
 0x806   : > { %v2189_v4 = vsel %vm619_vm0, %v2185_v13, 0.0 }
 0x807   : > { %2190 = vadd.xlane.f32.xlu1 %v2189_v4 }
 0x872   : > { %v2188_v7 = vpop.xlane.xlu0 %2187 }
 0x873   : > { %v2192_v8 = vmul.f32 %v2188_v7, %v3037_v10 }
 0x875   : > { %v2194_v9 = vadd.f32 1e-05, %v2192_v8 }
 0x877   : > { %2772 = vrsqrt.f32 %v2194_v9  ;;  %vm2202_vm14 = vweird.f32 %v2194_v9 }
 0x87a   : > { %v2191_v40 = vpop.xlane.xlu1 %2190 }
 0x87b   : > { %v2193_v29 = vmul.f32 %v2191_v40, %v3037_v10  ;;  %v2730_v10 = vld [vmem:[%s570_s27] ss:$0 sm:$0xff] }
 0x87d   : > { %v2773_v39 = vpop.eup %2772  ;;  %v2195_v34 = vadd.f32 1e-05, %v2193_v29 }
 0x87e   : > { %v2197_v14 = vmul.f32 %v2773_v39, %v2194_v9  ;;  %vm2203_vm13 = vweird.f32 %v2773_v39 }
 0x87f   : > { %2774 = vrsqrt.f32 %v2195_v34  ;;  %vm2204_vm15 = vmor %vm2202_vm14, %vm2203_vm13  ;;  %vm2212_vm2 = vweird.f32 %v2195_v34 }
 0x880   : > { %v2198_v15 = vmul.f32 %v2773_v39, %v2197_v14  ;;  %v2884_v14 = vmov 1065369472  }
 0x882   : > { %v2199_v16 = vmul.f32 0.5, %v2198_v15  ;;  %v2290_v15 = vunpack.c.h.bf16 %v2884_v14 }
 0x884   : > { %v2200_v17 = vsub.f32 1.5, %v2199_v16  ;;  %v2291_v16 = vunpack.c.l.bf16 %v2884_v14 }
 0x885   : > { %v2775_v48 = vpop.eup %2774 }
 0x886   : > { %v2201_v5 = vmul.f32 %v2773_v39, %v2200_v17  ;;  %v2207_v18 = vmul.f32 %v2775_v48, %v2195_v34  ;;  %vm2213_vm1 = vweird.f32 %v2775_v48 }
 0x887   : > { %vm2214_vm3 = vmor %vm2212_vm2, %vm2213_vm1 }
 0x888   : > { %v2208_v19 = vmul.f32 %v2775_v48, %v2207_v18  ;;  %v2205_v53 = vsel %vm2204_vm15, %v2773_v39, %v2201_v5 }
 0x889   : > { %v2216_v21 = vmul.f32 %v2205_v53, %v2182_v55  ;;  %v2674_v55 = vld [vmem:[%s3026_s17 + $0x8] sm:$0xff] }
 0x88a   : > { %v2209_v20 = vmul.f32 0.5, %v2208_v19  ;;  %2385 = vmatpush.bf16.msra.mxu3 %v2674_v55 }
 0x88b   : > { %v2221_v25 = vmul.f32 %v2730_v10, %v2216_v21 }
 0x88c   : > { %v2210_v12 = vsub.f32 1.5, %v2209_v20 }
 0x88d   : > { %v2226_v28 = vadd.f32 %v2731_v24, %v2221_v25 }
 0x88e   : > { %v2211_v22 = vmul.f32 %v2775_v48, %v2210_v12  ;;  %2386 = vmatpush.bf16.msra.mxu3 %v2673_v1 }
 0x890   : > { %v2215_v23 = vsel %vm2214_vm3, %v2775_v48, %v2211_v22 }
 0x891   : > { %v2217_v26 = vmul.f32 %v2215_v23, %v2183_v3 }
 0x893   : > { %v2222_v27 = vmul.f32 %v2730_v10, %v2217_v26 }
 0x895   : > { %v2227_v57 = vadd.f32 %v2731_v24, %v2222_v27 }
 0x897   : > { %v2228_v30 = vpack.c.bf16 %v2227_v57, %v2226_v28  ;;  %v2733_v28 = vld [vmem:[%s589_s21] ss:$0 sm:$0xff] }
 0x899   : > { %2626 = vmatmul.msk.bf16.vlgmr.msra.gmra.mxu2 %vm619_vm0, %v2228_v30 }
 0x91c   : > { %v2261_v60 = vpop.f32.mrf.mxu2 }
 0x91d   : > { %v2262_v58 = vadd.f32 %v2732_v54, %v2261_v60 }
 0x91f   : > { %v2266_v32 = vpack.c.bf16 %v2262_v58, %v2262_v58 }
 0x921   : > { %v2268_v2 = vunpack.c.l.bf16 %v2266_v32 }
 0x923   : > { %v2270_v35 = vmul.f32 1.703125, %v2268_v2 }
 0x924   : > { %v2263_v38 = vpop.f32.mrf.mxu2 }
 0x925   : > { %v2272_v41 = vpack.c.bf16 %v2270_v35, %v2270_v35  ;;  %v2264_v42 = vadd.f32 %v2732_v54, %v2263_v38 }
 0x927   : > { %v2274_v43 = vxor.u32 2147516416, %v2272_v41  ;;  %v2267_v44 = vpack.c.bf16 %v2264_v42, %v2264_v42 }
 0x929   : > { %v2276_v36 = vunpack.c.l.bf16 %v2274_v43  ;;  %v2269_v47 = vunpack.c.l.bf16 %v2267_v44 }
 0x92b   : > { %v2278_v52 = vmul.f32 1.442695, %v2276_v36  ;;  %v2271_v49 = vmul.f32 1.703125, %v2269_v47 }
 0x92d   : > { %2776 = vpow2.f32 %v2278_v52  ;;  %v2273_v56 = vpack.c.bf16 %v2271_v49, %v2271_v49 }
 0x92f   : > { %v2275_v51 = vxor.u32 2147516416, %v2273_v56 }
 0x931   : > { %v2277_v61 = vunpack.c.l.bf16 %v2275_v51 }
 0x933   : > { %v2777_v62 = vpop.eup %2776  ;;  %v2280_v45 = vmul.f32 1.442695, %v2277_v61 }
 0x934   : > { %v2282_v3 = vpack.c.bf16 %v2777_v62, %v2777_v62 }
 0x935   : > { %2778 = vpow2.f32 %v2280_v45 }
 0x936   : > { %v2284_v13 = vunpack.c.l.bf16 %v2282_v3 }
 0x938   : > { %v2286_v4 = vadd.f32 1.0, %v2284_v13 }
 0x93a   : > { %v2288_v6 = vpack.c.bf16 %v2286_v4, %v2286_v4 }
 0x93b   : > { %v2779_v7 = vpop.eup %2778 }
 0x93c   : > { %v2292_v8 = vunpack.c.h.bf16 %v2288_v6  ;;  %v2293_v9 = vunpack.c.l.bf16 %v2288_v6  ;;  %v2283_v11 = vpack.c.bf16 %v2779_v7, %v2779_v7 }
 0x93e   : > { %2780 = vrcp.f32 %v2292_v8  ;;  %v2285_v40 = vunpack.c.l.bf16 %v2283_v11 }
 0x93f   : > { %2782 = vrcp.f32 %v2293_v9 }
 0x940   : > { %v2287_v29 = vadd.f32 1.0, %v2285_v40 }
 0x942   : > { %v2289_v39 = vpack.c.bf16 %v2287_v29, %v2287_v29 }
 0x944   : > { %v2781_v34 = vpop.eup %2780  ;;  %v2299_v17 = vunpack.c.h.bf16 %v2289_v39  ;;  %v2300_v48 = vunpack.c.l.bf16 %v2289_v39 }
 0x945   : > { %v2783_v5 = vpop.eup %2782  ;;  %v2295_v18 = vmul.f32 %v2781_v34, %v2290_v15 }
 0x946   : > { %2784 = vrcp.f32 %v2299_v17  ;;  %v2297_v19 = vmul.f32 %v2783_v5, %v2291_v16 }
 0x947   : > { %2786 = vrcp.f32 %v2300_v48 }
 0x948   : > { %v2298_v20 = vpack.c.bf16 %v2295_v18, %v2297_v19 }
 0x94a   : > { %v2306_v22 = vunpack.c.l.bf16 %v2298_v20 }
 0x94c   : > { %v2785_v53 = vpop.eup %2784  ;;  %v2308_v25 = vmul.f32 %v2306_v22, %v2268_v2 }
 0x94d   : > { %v2787_v12 = vpop.eup %2786  ;;  %v2302_v10 = vmul.f32 %v2785_v53, %v2290_v15 }
 0x94e   : > { %v2304_v21 = vmul.f32 %v2787_v12, %v2291_v16 }
 0x950   : > { %v2305_v23 = vpack.c.bf16 %v2302_v10, %v2304_v21 }
 0x952   : > { %v2307_v24 = vunpack.c.l.bf16 %v2305_v23 }
 0x954   : > { %v2309_v26 = vmul.f32 %v2307_v24, %v2269_v47 }
 0x956   : > { %v2310_v27 = vpack.c.bf16 %v2309_v26, %v2308_v25 }
 0x958   : > { %2387 = vmatmul.bf16.vlgmr.msra.gmra.mxu3 %v2310_v27 }
 0x9db   : > { %v2388_v57 = vpop.f32.mrf.mxu3 }
 0x9dc   : > { %v2389_v30 = vadd.f32 %v2733_v28, %v2388_v57 }
 0x9de   : > { %v2393_v31 = vadd.f32 %v2389_v30, %v3481_v46 }
 0x9e0   : > { %2395 = vst.msk [vmem:[#allocation2] sm:$0xff] %vm619_vm0, %v2393_v31 }
 0x9e3   : > { %v2390_v54 = vpop.f32.mrf.mxu3 }
 0x9e4   : > { %v2391_v59 = vadd.f32 %v2733_v28, %v2390_v54 }
 0x9e6   : > { %v2394_v60 = vadd.f32 %v2391_v59, %v3485_v50 }
 0x9e8   : > { %2396 = vst.msk [vmem:[#allocation2 + $0x8] sm:$0xff] %vm619_vm0, %v2394_v60 }
 0x9e9   : > { %2682 = dma.vmem_to_hbm [thread:$0]  (%p2685_p6), %s2406_s25, 256, %s2408_s16, [#allocation3], %s2886_s30, %s2886_s30, %s2881_s26  }
 0x9ea   : > { %2857 = dma.done.wait (%p2685_p6), [#allocation3], 256  }
 0x9eb   : > { %2859 = vsyncadd (%p2685_p6), [#allocation3], 4294967040 }
 0x9ec PF: > { %s3581_s21 = sld [smem:[#allocation12_spill]] }
 0x9ed   : > { %s3582_s25 = sld [smem:[#allocation11_spill]] }
 0x9ee   : > { %s3583_s26 = sld [smem:[#allocation13_spill]] }
 0x9f2   : > { %s24_s27 = sadd.s32 1, %s3581_s21  }
 0x9f3   : > { %p21_p7 = scmp.ge.s32.totalorder %s24_s27, 4  }
 0x9f5   :  { %23 = sbr.rel (!%p21_p7) target bundleno = 6 (0x6), region = 139 }
 0x9fa   :  { %2424 = vsyncpa [#allocation3], 1 }
 0x9fb   :  { %2426 = vsyncpa [#allocation3 + $0x1], 1 }

</bundles_post_ra>
